<compile_context>
chip_gen: v7x
topology: tpu7x:2x2x1
jax: 0.10.0
libtpu: 0.0.40
codegen_flags: <defaults>
</compile_context>

<pallas_src>
import functools
import math

import jax
import jax.numpy as jnp
from jax import lax
from jax.experimental import pallas as pl
from jax.experimental.pallas import tpu as pltpu


def _round_up(x, m):
    return (x + m - 1) // m * m


def _vmem_capacity_bytes():
    """Physical per-core VMEM (v5e/v6e: 128 MiB, v7x: 64 MiB); safe fallback."""
    try:
        return int(pltpu.get_tpu_info().vmem_capacity_bytes)
    except Exception:
        return 64 * 1024 * 1024   # conservative: v7x per-TensorCore VMEM


def _vmem_limit(need_bytes):
    """Scoped-VMEM limit derived from the actual tile footprint, chip-clamped."""
    cap = _vmem_capacity_bytes()
    return int(min(max(need_bytes + (8 << 20), 32 << 20), int(cap * 0.9)))


# `support` is kept fully VMEM-resident (loaded once) when its double-buffered
# footprint stays under this budget; otherwise fall back to streaming K-blocks.
_RESIDENT_SUPPORT_BUDGET = 16 * 1024 * 1024


# --------------------------------------------------------------------------
# Kernel 1: support = x @ W^T + b   (nn.Linear), row-tiled over nodes.
# --------------------------------------------------------------------------
def linear_kernel(x_ref, w_ref, b_ref, out_ref):
    # Contract the in_features axis of both operands (== x @ W^T) without a
    # wrapper-side transpose; accumulate in f32 on the MXU.
    acc = lax.dot_general(
        x_ref[...], w_ref[...],
        dimension_numbers=(((1,), (1,)), ((), ())),
        preferred_element_type=jnp.float32)
    out_ref[...] = (acc + b_ref[...]).astype(out_ref.dtype)


def linear(x, w, b, tm, *, out_dtype=jnp.bfloat16):
    """x: (n_pad, in_f_pad) bf16, w: (f_pad, in_f_pad) bf16, b: (1, f_pad) f32."""
    n_pad, in_f = x.shape
    f_pad = w.shape[0]
    need = (2 * tm * in_f * 2 + 2 * f_pad * in_f * 2
            + 2 * 8 * f_pad * 4 + 2 * tm * f_pad * 2)
    return pl.pallas_call(
        linear_kernel,
        out_shape=jax.ShapeDtypeStruct((n_pad, f_pad), out_dtype),
        grid_spec=pltpu.PrefetchScalarGridSpec(
            num_scalar_prefetch=0,
            grid=(n_pad // tm,),
            in_specs=[
                pl.BlockSpec((tm, in_f), lambda i: (i, 0)),
                pl.BlockSpec((f_pad, in_f), lambda i: (0, 0)),
                pl.BlockSpec((1, f_pad), lambda i: (0, 0)),
            ],
            out_specs=pl.BlockSpec((tm, f_pad), lambda i: (i, 0)),
        ),
        compiler_params=pltpu.CompilerParams(
            dimension_semantics=("parallel",),
            vmem_limit_bytes=_vmem_limit(need),
        ),
    )(x, w, b)


# --------------------------------------------------------------------------
# Kernel 2: s2 = relu(adj @ s1) @ W2^T + b2   (layer-1 SpMM + fused layer-2
# linear in the k==last epilogue). K-accumulation over adj columns.
# --------------------------------------------------------------------------
def spmm_fused_kernel(adj_ref, s_ref, w2_ref, b2_ref, out_ref, acc_ref,
                      *, tk, resident_support, apply_relu):
    k = pl.program_id(1)

    @pl.when(k == 0)
    def _():
        acc_ref[...] = jnp.zeros_like(acc_ref)

    if resident_support:
        # support is the whole (n_pad, h_pad) array in VMEM; slice the K block.
        row = pl.multiple_of(k * tk, tk)
        s_blk = s_ref[pl.ds(row, tk), :]
    else:
        s_blk = s_ref[...]

    acc_ref[...] += jnp.dot(adj_ref[...], s_blk,
                            preferred_element_type=jnp.float32)

    @pl.when(k == pl.num_programs(1) - 1)
    def _():
        h = acc_ref[...]
        if apply_relu:
            h = jnp.maximum(h, 0.0)
        # Fused layer-2 linear: s2 = h @ W2^T + b2 (contract in_features axes).
        s2 = lax.dot_general(
            h.astype(w2_ref.dtype), w2_ref[...],
            dimension_numbers=(((1,), (1,)), ((), ())),
            preferred_element_type=jnp.float32) + b2_ref[...]
        out_ref[...] = s2.astype(out_ref.dtype)


def spmm_fused(adj, support, w2, b2, tm, tk, *, apply_relu,
               out_dtype=jnp.bfloat16):
    """adj: (n_pad, n_pad) bf16, support: (n_pad, h_pad) bf16,
       w2: (c_pad, h_pad) bf16, b2: (1, c_pad) f32."""
    n_pad = adj.shape[0]
    h_pad = support.shape[1]
    c_pad = w2.shape[0]
    ssize = jnp.dtype(support.dtype).itemsize

    resident = 2 * n_pad * h_pad * ssize <= _RESIDENT_SUPPORT_BUDGET
    if resident:
        s_spec = pl.BlockSpec((n_pad, h_pad), lambda i, k: (0, 0))
        s_bytes = 2 * n_pad * h_pad * ssize
    else:
        # Fallback: stream the K block (re-read per row tile) when too big.
        s_spec = pl.BlockSpec((tk, h_pad), lambda i, k: (k, 0))
        s_bytes = 2 * tk * h_pad * ssize

    need = (2 * tm * tk * 2 + s_bytes + 2 * c_pad * h_pad * 2
            + 2 * 8 * c_pad * 4 + 2 * tm * c_pad * 2 + tm * h_pad * 4)

    kern = functools.partial(spmm_fused_kernel, tk=tk,
                             resident_support=resident,
                             apply_relu=apply_relu)
    return pl.pallas_call(
        kern,
        out_shape=jax.ShapeDtypeStruct((n_pad, c_pad), out_dtype),
        grid_spec=pltpu.PrefetchScalarGridSpec(
            num_scalar_prefetch=0,
            grid=(n_pad // tm, n_pad // tk),
            in_specs=[
                pl.BlockSpec((tm, tk), lambda i, k: (i, k)),
                s_spec,
                pl.BlockSpec((c_pad, h_pad), lambda i, k: (0, 0)),
                pl.BlockSpec((1, c_pad), lambda i, k: (0, 0)),
            ],
            out_specs=pl.BlockSpec((tm, c_pad), lambda i, k: (i, 0)),
            scratch_shapes=[pltpu.VMEM((tm, h_pad), jnp.float32)],
        ),
        compiler_params=pltpu.CompilerParams(
            dimension_semantics=("parallel", "arbitrary"),
            vmem_limit_bytes=_vmem_limit(need),
        ),
    )(adj, support, w2, b2)


# --------------------------------------------------------------------------
# Kernel 3: out = adj @ s2, f32 output used directly as the accumulator
# (no scratch, no finalize copy).
# --------------------------------------------------------------------------
def spmm_accum_kernel(adj_ref, s_ref, out_ref, *, tk, resident_support):
    k = pl.program_id(1)

    @pl.when(k == 0)
    def _():
        out_ref[...] = jnp.zeros(out_ref.shape, out_ref.dtype)

    if resident_support:
        row = pl.multiple_of(k * tk, tk)
        s_blk = s_ref[pl.ds(row, tk), :]
    else:
        s_blk = s_ref[...]

    out_ref[...] += jnp.dot(adj_ref[...], s_blk,
                            preferred_element_type=jnp.float32)


def spmm_accum(adj, support, tm, tk, *, out_dtype=jnp.float32):
    """adj: (n_pad, n_pad) bf16, support: (n_pad, c_pad) bf16 -> (n_pad, c_pad) f32."""
    n_pad = adj.shape[0]
    f_pad = support.shape[1]
    ssize = jnp.dtype(support.dtype).itemsize

    resident = 2 * n_pad * f_pad * ssize <= _RESIDENT_SUPPORT_BUDGET
    if resident:
        s_spec = pl.BlockSpec((n_pad, f_pad), lambda i, k: (0, 0))
        s_bytes = 2 * n_pad * f_pad * ssize
    else:
        s_spec = pl.BlockSpec((tk, f_pad), lambda i, k: (k, 0))
        s_bytes = 2 * tk * f_pad * ssize

    need = 2 * tm * tk * 2 + s_bytes + 2 * tm * f_pad * 4

    kern = functools.partial(spmm_accum_kernel, tk=tk,
                             resident_support=resident)
    return pl.pallas_call(
        kern,
        out_shape=jax.ShapeDtypeStruct((n_pad, f_pad), out_dtype),
        grid_spec=pltpu.PrefetchScalarGridSpec(
            num_scalar_prefetch=0,
            grid=(n_pad // tm, n_pad // tk),
            in_specs=[
                pl.BlockSpec((tm, tk), lambda i, k: (i, k)),
                s_spec,
            ],
            out_specs=pl.BlockSpec((tm, f_pad), lambda i, k: (i, 0)),
        ),
        compiler_params=pltpu.CompilerParams(
            dimension_semantics=("parallel", "arbitrary"),
            vmem_limit_bytes=_vmem_limit(need),
        ),
    )(adj, support)


# --------------------------------------------------------------------------
# Parameters / preparation / forward
# --------------------------------------------------------------------------
def init_gcn_params(key, nfeat, nhid, nclass):
    """Deterministic init mirroring GraphConvolution.init / nn.Linear defaults."""
    k1, k2, k3, k4 = jax.random.split(key, 4)
    stdv1 = 1.0 / math.sqrt(nfeat)
    stdv2 = 1.0 / math.sqrt(nhid)
    return {
        "w1": jax.random.uniform(k1, (nhid, nfeat), jnp.float32, -stdv1, stdv1),
        "b1": jax.random.uniform(k2, (nhid,), jnp.float32, -stdv1, stdv1),
        "w2": jax.random.uniform(k3, (nclass, nhid), jnp.float32, -stdv2, stdv2),
        "b2": jax.random.uniform(k4, (nclass,), jnp.float32, -stdv2, stdv2),
    }


def prepare_gcn(params, adj, *, tile_n=1024):
    """One-time padding + bf16 cast of weights and adjacency.

    Hoisted out of the per-call forward so the (N,N) adjacency is not
    re-padded / re-cast (an extra N^2 HBM copy) on every step.
    """
    n = adj.shape[0]
    nhid, nfeat = params["w1"].shape
    nclass = params["w2"].shape[0]

    blk = min(tile_n, _round_up(n, 128))     # node tile (tm == tk)
    n_pad = _round_up(n, blk)
    f_pad = _round_up(nfeat, 128)            # lane-dense in_features
    h_pad = _round_up(nhid, 128)
    c_pad = _round_up(nclass, 128)

    bf = jnp.bfloat16
    padded = {
        "adj": jnp.zeros((n_pad, n_pad), bf).at[:n, :n].set(adj.astype(bf)),
        "w1": jnp.zeros((h_pad, f_pad), bf).at[:nhid, :nfeat].set(
            params["w1"].astype(bf)),
        "b1": jnp.zeros((1, h_pad), jnp.float32).at[0, :nhid].set(params["b1"]),
        "w2": jnp.zeros((c_pad, h_pad), bf).at[:nclass, :nhid].set(
            params["w2"].astype(bf)),
        "b2": jnp.zeros((1, c_pad), jnp.float32).at[0, :nclass].set(params["b2"]),
    }
    geom = dict(n_nodes=n, nclass=nclass, blk=blk)
    return padded, geom


def gcn_forward(padded, x, *, n_nodes, nclass, blk, use_relu=True):
    adj_p = padded["adj"]
    w1_p, b1_p = padded["w1"], padded["b1"]
    w2_p, b2_p = padded["w2"], padded["b2"]
    n_pad = adj_p.shape[0]
    f_pad = w1_p.shape[1]

    bf = jnp.bfloat16
    n, nfeat = x.shape
    x_p = jnp.zeros((n_pad, f_pad), bf).at[:n, :nfeat].set(x.astype(bf))

    # ----- layer 1 linear: s1 = x @ W1^T + b1 -----
    s1 = linear(x_p, w1_p, b1_p, blk)                          # (n_pad, h_pad) bf16
    # ----- layer 1 aggregation + ReLU, fused with layer-2 linear:
    #       s2 = relu(adj @ s1) @ W2^T + b2 -----
    s2 = spmm_fused(adj_p, s1, w2_p, b2_p, blk, blk,
                    apply_relu=use_relu)                       # (n_pad, c_pad) bf16
    # dropout: eval mode -> identity
    # ----- layer 2 aggregation: out = adj @ s2 -----
    out = spmm_accum(adj_p, s2, blk, blk)                      # (n_pad, c_pad) f32

    return out[:n_nodes, :nclass]


if __name__ == "__main__":
    key = jax.random.PRNGKey(0)
    k_param, k_x, k_adj = jax.random.split(key, 3)

    N, NFEAT, NHID, NCLASS = 256, 32, 32, 8

    params = init_gcn_params(k_param, NFEAT, NHID, NCLASS)
    x = jax.random.normal(k_x, (N, NFEAT), jnp.float32)

    # simple symmetric, row-normalized dense adjacency (with self loops)
    a = (jax.random.uniform(k_adj, (N, N)) > 0.9).astype(jnp.float32)
    a = jnp.maximum(a, a.T) + jnp.eye(N, dtype=jnp.float32)
    adj = a / jnp.sum(a, axis=1, keepdims=True)

    # tile_n=128 so the small demo exercises a multi-tile (2 x 2) grid; real
    # graphs should use the default tile_n=1024.
    padded, geom = prepare_gcn(params, adj, tile_n=128)
    fwd = jax.jit(functools.partial(gcn_forward, use_relu=True, **geom))
    out = jax.block_until_ready(fwd(padded, x))

    # sanity-check against plain-JAX f32 reference (bf16 inputs -> loose tol)
    ref_h = jnp.maximum(adj @ (x @ params["w1"].T + params["b1"]), 0.0)
    ref = adj @ (ref_h @ params["w2"].T + params["b2"])
    assert out.shape == (N, NCLASS)
    err = jnp.max(jnp.abs(out - ref))
    assert jnp.allclose(out, ref, atol=3e-2, rtol=3e-2), f"max |err| = {err}"

    print("KERNEL_OK")
</pallas_src>

<mosaic_0001>
module attributes {stable_mosaic.version = 11 : i64} {
  func.func @spmm_accum_kernel(%arg0: i32, %arg1: i32, %arg2: memref<128x128xbf16, #tpu.memory_space<vmem>>, %arg3: memref<256x128xbf16, #tpu.memory_space<vmem>>, %arg4: memref<128x128xf32, #tpu.memory_space<vmem>>) attributes {dimension_semantics = [#tpu.dimension_semantics<parallel>, #tpu.dimension_semantics<arbitrary>], iteration_bounds = array<i64: 2, 2>, scalar_prefetch = 0 : i64, scratch_operands = 0 : i64, tpu.core_type = #tpu.core_type<tc>, window_params = [{transform_indices = @transform_0, window_bounds = array<i64: 128, 128>}, {pipeline_mode = #tpu.pipeline_mode<synchronous>, transform_indices = @transform_1, window_bounds = array<i64: 256, 128>}, {transform_indices = @transform_2, window_bounds = array<i64: 128, 128>}]} {
    %c0_i32 = arith.constant 0 : i32
    %0 = arith.cmpi eq, %arg1, %c0_i32 : i32
    %1 = arith.extui %0 : i1 to i32
    %c0_i32_0 = arith.constant 0 : i32
    %2 = arith.cmpi ne, %1, %c0_i32_0 : i32
    scf.if %2 {
      %cst_7 = arith.constant 0.000000e+00 : f32
      %12 = vector.broadcast %cst_7 : f32 to vector<128x128xf32>
      %c0_8 = arith.constant 0 : index
      %c0_9 = arith.constant 0 : index
      %13 = vector.load %arg4[%c0_8, %c0_9] : memref<128x128xf32, #tpu.memory_space<vmem>>, vector<128x128xf32>
      tpu.vector_store %arg4[%c0_8, %c0_9], %12 {strides = array<i32>} : memref<128x128xf32, #tpu.memory_space<vmem>>, vector<128x128xf32>,
    } else {
    }
    %c128_i32 = arith.constant 128 : i32
    %3 = arith.muli %arg1, %c128_i32 : i32
    %4 = tpu.assume_multiple %3, 128 : i32
    %5 = arith.index_cast %4 : i32 to index
    %c0 = arith.constant 0 : index
    %6 = vector.load %arg3[%5, %c0] : memref<256x128xbf16, #tpu.memory_space<vmem>>, vector<128x128xbf16>
    %c0_1 = arith.constant 0 : index
    %c0_2 = arith.constant 0 : index
    %7 = vector.load %arg4[%c0_1, %c0_2] : memref<128x128xf32, #tpu.memory_space<vmem>>, vector<128x128xf32>
    %c0_3 = arith.constant 0 : index
    %c0_4 = arith.constant 0 : index
    %8 = vector.load %arg2[%c0_3, %c0_4] : memref<128x128xbf16, #tpu.memory_space<vmem>>, vector<128x128xbf16>
    %cst = arith.constant dense<0.000000e+00> : vector<128x128xf32>
    %9 = tpu.matmul %8, %6, %cst {dimension_numbers = #tpu.dot_dimension_numbers<[1], [0], [0], [1], [0, 0, 1, 1], [], []>} : vector<128x128xbf16>, vector<128x128xbf16>, vector<128x128xf32> -> vector<128x128xf32>
    %10 = arith.addf %7, %9 : vector<128x128xf32>
    %c0_5 = arith.constant 0 : index
    %c0_6 = arith.constant 0 : index
    %11 = vector.load %arg4[%c0_5, %c0_6] : memref<128x128xf32, #tpu.memory_space<vmem>>, vector<128x128xf32>
    tpu.vector_store %arg4[%c0_5, %c0_6], %10 {strides = array<i32>} : memref<128x128xf32, #tpu.memory_space<vmem>>, vector<128x128xf32>,
    return
  }
  func.func @transform_0(%arg0: i32, %arg1: i32) -> (i32, i32) {
    %c0_i32 = arith.constant 0 : i32
    return %arg0, %arg1 : i32, i32
  }
  func.func @transform_1(%arg0: i32, %arg1: i32) -> (i32, i32) {
    %c0_i32 = arith.constant 0 : i32
    %c0_i32_0 = arith.constant 0 : i32
    %c0_i32_1 = arith.constant 0 : i32
    return %c0_i32, %c0_i32_0 : i32, i32
  }
  func.func @transform_2(%arg0: i32, %arg1: i32) -> (i32, i32) {
    %c0_i32 = arith.constant 0 : i32
    %c0_i32_0 = arith.constant 0 : i32
    return %arg0, %c0_i32 : i32, i32
  }
}

module attributes {stable_mosaic.version = 11 : i64} {
  func.func @spmm_fused_kernel(%arg0: i32, %arg1: i32, %arg2: memref<128x128xbf16, #tpu.memory_space<vmem>>, %arg3: memref<256x128xbf16, #tpu.memory_space<vmem>>, %arg4: memref<128x128xbf16, #tpu.memory_space<vmem>>, %arg5: memref<1x128xf32, #tpu.memory_space<vmem>>, %arg6: memref<128x128xbf16, #tpu.memory_space<vmem>>, %arg7: memref<128x128xf32, #tpu.memory_space<vmem>>) attributes {dimension_semantics = [#tpu.dimension_semantics<parallel>, #tpu.dimension_semantics<arbitrary>], iteration_bounds = array<i64: 2, 2>, scalar_prefetch = 0 : i64, scratch_operands = 1 : i64, tpu.core_type = #tpu.core_type<tc>, window_params = [{transform_indices = @transform_0, window_bounds = array<i64: 128, 128>}, {pipeline_mode = #tpu.pipeline_mode<synchronous>, transform_indices = @transform_1, window_bounds = array<i64: 256, 128>}, {pipeline_mode = #tpu.pipeline_mode<synchronous>, transform_indices = @transform_2, window_bounds = array<i64: 128, 128>}, {pipeline_mode = #tpu.pipeline_mode<synchronous>, transform_indices = @transform_3, window_bounds = array<i64: 1, 128>}, {transform_indices = @transform_4, window_bounds = array<i64: 128, 128>}]} {
    %c0_i32 = arith.constant 0 : i32
    %0 = arith.cmpi eq, %arg1, %c0_i32 : i32
    %1 = arith.extui %0 : i1 to i32
    %c0_i32_0 = arith.constant 0 : i32
    %2 = arith.cmpi ne, %1, %c0_i32_0 : i32
    scf.if %2 {
      %cst_8 = arith.constant 0.000000e+00 : f32
      %15 = vector.broadcast %cst_8 : f32 to vector<128x128xf32>
      %c0_9 = arith.constant 0 : index
      %c0_10 = arith.constant 0 : index
      %16 = vector.load %arg7[%c0_9, %c0_10] : memref<128x128xf32, #tpu.memory_space<vmem>>, vector<128x128xf32>
      tpu.vector_store %arg7[%c0_9, %c0_10], %15 {strides = array<i32>} : memref<128x128xf32, #tpu.memory_space<vmem>>, vector<128x128xf32>,
    } else {
    }
    %c128_i32 = arith.constant 128 : i32
    %3 = arith.muli %arg1, %c128_i32 : i32
    %4 = tpu.assume_multiple %3, 128 : i32
    %5 = arith.index_cast %4 : i32 to index
    %c0 = arith.constant 0 : index
    %6 = vector.load %arg3[%5, %c0] : memref<256x128xbf16, #tpu.memory_space<vmem>>, vector<128x128xbf16>
    %c0_1 = arith.constant 0 : index
    %c0_2 = arith.constant 0 : index
    %7 = vector.load %arg7[%c0_1, %c0_2] : memref<128x128xf32, #tpu.memory_space<vmem>>, vector<128x128xf32>
    %c0_3 = arith.constant 0 : index
    %c0_4 = arith.constant 0 : index
    %8 = vector.load %arg2[%c0_3, %c0_4] : memref<128x128xbf16, #tpu.memory_space<vmem>>, vector<128x128xbf16>
    %cst = arith.constant dense<0.000000e+00> : vector<128x128xf32>
    %9 = tpu.matmul %8, %6, %cst {dimension_numbers = #tpu.dot_dimension_numbers<[1], [0], [0], [1], [0, 0, 1, 1], [], []>} : vector<128x128xbf16>, vector<128x128xbf16>, vector<128x128xf32> -> vector<128x128xf32>
    %10 = arith.addf %7, %9 : vector<128x128xf32>
    %c0_5 = arith.constant 0 : index
    %c0_6 = arith.constant 0 : index
    %11 = vector.load %arg7[%c0_5, %c0_6] : memref<128x128xf32, #tpu.memory_space<vmem>>, vector<128x128xf32>
    tpu.vector_store %arg7[%c0_5, %c0_6], %10 {strides = array<i32>} : memref<128x128xf32, #tpu.memory_space<vmem>>, vector<128x128xf32>,
    %c1_i32 = arith.constant 1 : i32
    %12 = arith.cmpi eq, %arg1, %c1_i32 : i32
    %13 = arith.extui %12 : i1 to i32
    %c0_i32_7 = arith.constant 0 : i32
    %14 = arith.cmpi ne, %13, %c0_i32_7 : i32
    scf.if %14 {
      %c0_8 = arith.constant 0 : index
      %c0_9 = arith.constant 0 : index
      %15 = vector.load %arg7[%c0_8, %c0_9] : memref<128x128xf32, #tpu.memory_space<vmem>>, vector<128x128xf32>
      %cst_10 = arith.constant 0.000000e+00 : f32
      %16 = vector.broadcast %cst_10 : f32 to vector<128x128xf32>
      %17 = arith.maximumf %15, %16 : vector<128x128xf32>
      %18 = arith.truncf %17 : vector<128x128xf32> to vector<128x128xbf16>
      %c0_11 = arith.constant 0 : index
      %c0_12 = arith.constant 0 : index
      %19 = vector.load %arg4[%c0_11, %c0_12] : memref<128x128xbf16, #tpu.memory_space<vmem>>, vector<128x128xbf16>
      %cst_13 = arith.constant dense<0.000000e+00> : vector<128x128xf32>
      %20 = tpu.matmul %18, %19, %cst_13 {dimension_numbers = #tpu.dot_dimension_numbers<[1], [1], [0], [0], [0, 0, 1, 0], [], []>} : vector<128x128xbf16>, vector<128x128xbf16>, vector<128x128xf32> -> vector<128x128xf32>
      %c0_14 = arith.constant 0 : index
      %c0_15 = arith.constant 0 : index
      %21 = vector.load %arg5[%c0_14, %c0_15] : memref<1x128xf32, #tpu.memory_space<vmem>>, vector<1x128xf32>
      %22 = vector.broadcast %21 : vector<1x128xf32> to vector<128x128xf32>
      %23 = arith.addf %20, %22 : vector<128x128xf32>
      %24 = arith.truncf %23 : vector<128x128xf32> to vector<128x128xbf16>
      %c0_16 = arith.constant 0 : index
      %c0_17 = arith.constant 0 : index
      %25 = vector.load %arg6[%c0_16, %c0_17] : memref<128x128xbf16, #tpu.memory_space<vmem>>, vector<128x128xbf16>
      tpu.vector_store %arg6[%c0_16, %c0_17], %24 {strides = array<i32>} : memref<128x128xbf16, #tpu.memory_space<vmem>>, vector<128x128xbf16>,
    } else {
    }
    return
  }
  func.func @transform_0(%arg0: i32, %arg1: i32) -> (i32, i32) {
    %c0_i32 = arith.constant 0 : i32
    return %arg0, %arg1 : i32, i32
  }
  func.func @transform_1(%arg0: i32, %arg1: i32) -> (i32, i32) {
    %c0_i32 = arith.constant 0 : i32
    %c0_i32_0 = arith.constant 0 : i32
    %c0_i32_1 = arith.constant 0 : i32
    return %c0_i32, %c0_i32_0 : i32, i32
  }
  func.func @transform_2(%arg0: i32, %arg1: i32) -> (i32, i32) {
    %c0_i32 = arith.constant 0 : i32
    %c0_i32_0 = arith.constant 0 : i32
    %c0_i32_1 = arith.constant 0 : i32
    return %c0_i32, %c0_i32_0 : i32, i32
  }
  func.func @transform_3(%arg0: i32, %arg1: i32) -> (i32, i32) {
    %c0_i32 = arith.constant 0 : i32
    %c0_i32_0 = arith.constant 0 : i32
    %c0_i32_1 = arith.constant 0 : i32
    return %c0_i32, %c0_i32_0 : i32, i32
  }
  func.func @transform_4(%arg0: i32, %arg1: i32) -> (i32, i32) {
    %c0_i32 = arith.constant 0 : i32
    %c0_i32_0 = arith.constant 0 : i32
    return %arg0, %c0_i32 : i32, i32
  }
}

module attributes {stable_mosaic.version = 11 : i64} {
  func.func @linear_kernel(%arg0: i32, %arg1: memref<128x128xbf16, #tpu.memory_space<vmem>>, %arg2: memref<128x128xbf16, #tpu.memory_space<vmem>>, %arg3: memref<1x128xf32, #tpu.memory_space<vmem>>, %arg4: memref<128x128xbf16, #tpu.memory_space<vmem>>) attributes {dimension_semantics = [#tpu.dimension_semantics<parallel>], iteration_bounds = array<i64: 2>, scalar_prefetch = 0 : i64, scratch_operands = 0 : i64, tpu.core_type = #tpu.core_type<tc>, window_params = [{transform_indices = @transform_0, window_bounds = array<i64: 128, 128>}, {pipeline_mode = #tpu.pipeline_mode<synchronous>, transform_indices = @transform_1, window_bounds = array<i64: 128, 128>}, {pipeline_mode = #tpu.pipeline_mode<synchronous>, transform_indices = @transform_2, window_bounds = array<i64: 1, 128>}, {transform_indices = @transform_3, window_bounds = array<i64: 128, 128>}]} {
    %c0 = arith.constant 0 : index
    %c0_0 = arith.constant 0 : index
    %0 = vector.load %arg1[%c0, %c0_0] : memref<128x128xbf16, #tpu.memory_space<vmem>>, vector<128x128xbf16>
    %c0_1 = arith.constant 0 : index
    %c0_2 = arith.constant 0 : index
    %1 = vector.load %arg2[%c0_1, %c0_2] : memref<128x128xbf16, #tpu.memory_space<vmem>>, vector<128x128xbf16>
    %cst = arith.constant dense<0.000000e+00> : vector<128x128xf32>
    %2 = tpu.matmul %0, %1, %cst {dimension_numbers = #tpu.dot_dimension_numbers<[1], [1], [0], [0], [0, 0, 1, 0], [], []>} : vector<128x128xbf16>, vector<128x128xbf16>, vector<128x128xf32> -> vector<128x128xf32>
    %c0_3 = arith.constant 0 : index
    %c0_4 = arith.constant 0 : index
    %3 = vector.load %arg3[%c0_3, %c0_4] : memref<1x128xf32, #tpu.memory_space<vmem>>, vector<1x128xf32>
    %4 = vector.broadcast %3 : vector<1x128xf32> to vector<128x128xf32>
    %5 = arith.addf %2, %4 : vector<128x128xf32>
    %6 = arith.truncf %5 : vector<128x128xf32> to vector<128x128xbf16>
    %c0_5 = arith.constant 0 : index
    %c0_6 = arith.constant 0 : index
    %7 = vector.load %arg4[%c0_5, %c0_6] : memref<128x128xbf16, #tpu.memory_space<vmem>>, vector<128x128xbf16>
    tpu.vector_store %arg4[%c0_5, %c0_6], %6 {strides = array<i32>} : memref<128x128xbf16, #tpu.memory_space<vmem>>, vector<128x128xbf16>,
    return
  }
  func.func @transform_0(%arg0: i32) -> (i32, i32) {
    %c0_i32 = arith.constant 0 : i32
    %c0_i32_0 = arith.constant 0 : i32
    return %arg0, %c0_i32 : i32, i32
  }
  func.func @transform_1(%arg0: i32) -> (i32, i32) {
    %c0_i32 = arith.constant 0 : i32
    %c0_i32_0 = arith.constant 0 : i32
    %c0_i32_1 = arith.constant 0 : i32
    return %c0_i32, %c0_i32_0 : i32, i32
  }
  func.func @transform_2(%arg0: i32) -> (i32, i32) {
    %c0_i32 = arith.constant 0 : i32
    %c0_i32_0 = arith.constant 0 : i32
    %c0_i32_1 = arith.constant 0 : i32
    return %c0_i32, %c0_i32_0 : i32, i32
  }
  func.func @transform_3(%arg0: i32) -> (i32, i32) {
    %c0_i32 = arith.constant 0 : i32
    %c0_i32_0 = arith.constant 0 : i32
    return %arg0, %c0_i32 : i32, i32
  }
}

</mosaic_0001>

<bundles_post_ra>
// kernel: gcn_forward.5
= control target key start
LH: loop header
LB: loop body
LE: loop exit
PB: predicated region body
PF: predicated region fallthrough
CT: control target
= control target key end

     0   :  { %s884_s9 = smov 0   ;;  %s886_s10 = smov 0   ;;  %s1065_s0 = inlined_call_operand.vmem [shape: bf16[256,256], index: 0, kind: input, shape index: {}]   ;;  %s1066_s1 = inlined_call_operand.vmem [shape: bf16[256,128], index: 1, kind: input, shape index: {}]   ;;  %s1067_s2 = inlined_call_operand.vmem [shape: f32[256,128], index: 2, kind: output, shape index: {}]  }
   0x1   :  { %s888_s11 = smov 0   ;;  %s890_s12 = smov 0  }
   0x2   :  { %s892_s13 = smov 0   ;;  %s894_s14 = smov 0  }
   0x3   :  { %s896_s15 = smov 0  }
   0x4 LB: > { %s21_s16 = sadd.s32 1, %s858_s13  ;;  %s24_s17 = sadd.s32 1, %s862_s14  ;;  %s866_s15 = sphi %s896_s15, %s12_s15   ;;  %s862_s14 = sphi %s894_s14, %s1073_s14   ;;  %s858_s13 = sphi %s892_s13, %s1072_s13   ;;  %s854_s12 = sphi %s890_s12, %s1071_s12   ;;  %s850_s11 = sphi %s888_s11, %s1070_s11   ;;  %s846_s10 = sphi %s886_s10, %s1069_s10   ;;  %s842_s9 = sphi %s884_s9, %s1068_s9  }
   0x5   : > { %p22_p0 = scmp.ge.s32.totalorder %s21_s16, 2  ;;  %p40_p1 = scmp.ne.s32.totalorder %s846_s10, %s842_s9 }
   0x6   : > { %p41_p2 = scmp.eq.s32.totalorder %s866_s15, 0  ;;  %s33_s21 = sadd.s32 1, %s846_s10 }
   0x7   : > { %s1075_s16 = smov (%p22_p0, %s21_s16), 0  ;;  %s1077_s17 = smov (!%p22_p0, %s24_s17), %s862_s14 }
   0x8   : > { %p42_p3 = por %p41_p2, %p40_p1  ;;  %p26_p4 = scmp.ge.s32.totalorder %s1077_s17, 2 }
   0x9   : > { %s29_s18 = ssub.s32 %s858_s13, %s1075_s16  ;;  %p644_p6 = scmp.ge.s32.totalorder %s866_s15, 4 }
   0xa   : > { %s1079_s17 = smov (%p26_p4, %s1077_s17), 0 }
   0xb   : > { %s28_s19 = ssub.s32 %s862_s14, %s1079_s17  ;;  %116 = sbr.rel (%p644_p6) target bundleno = 34 (0x22), region = 20 }
   0xc   : > { %s30_s20 = sor.u32 %s29_s18, %s28_s19 }
   0xd   : > { %p31_p5 = scmp.eq.s32.totalorder %s30_s20, 0 }
   0xf   : > { %s935_s22 = scalar_select %p31_p5, %s846_s10, %s33_s21  }
  0x12   : > { %119 = sbr.rel (!%p42_p3) target bundleno = 34 (0x22), region = 24  ;;  %s121_s23 = sand.u32 (%p42_p3), 1, %s846_s10  }
  0x13   : > { %s674_s24 = sshll.u32 (%p42_p3), %s862_s14, 5  ;;  %s645_s25 = sshll.u32 (%p42_p3), %s121_s23, 6 }
  0x14   : > { %s126_s26 = sadd.s32 (%p42_p3), %s858_s13, %s674_s24  ;;  %s123_s3 = scalar_lea.vmem (%p42_p3), [#allocation2], %s645_s25 }
  0x15   : > { %s648_s27 = sshll.u32 (%p42_p3), %s126_s26, 2 }
  0x16   : > { %s944_s30 = scalar_lea.vmem (%p42_p3), %s1065_s0, %s648_s27 }
  0x17   : > { %v144_v0 = vld [vmem:[%s944_s30] sm:$0xf] (%p42_p3)  ;;  %v146_v1 = vld [vmem:[%s944_s30 + $0x8] sm:$0xf] (%p42_p3)  ;;  %v148_v2 = vld [vmem:[%s944_s30 + $0x10] sm:$0xf] (%p42_p3) }
  0x18   : > { %145 = vst [vmem:[%s123_s3] sm:$0xf] (%p42_p3), %v144_v0  ;;  %147 = vst [vmem:[%s123_s3 + $0x4] sm:$0xf] (%p42_p3), %v146_v1  ;;  %v150_v3 = vld [vmem:[%s944_s30 + $0x18] sm:$0xf] (%p42_p3) }
  0x19   : > { %149 = vst [vmem:[%s123_s3 + $0x8] sm:$0xf] %v148_v2  ;;  %v152_v4 = vld [vmem:[%s944_s30 + $0x20] sm:$0xf]  ;;  %v154_v5 = vld [vmem:[%s944_s30 + $0x28] sm:$0xf] }
  0x1a   : > { %151 = vst [vmem:[%s123_s3 + $0xc] sm:$0xf] %v150_v3  ;;  %153 = vst [vmem:[%s123_s3 + $0x10] sm:$0xf] %v152_v4  ;;  %v156_v6 = vld [vmem:[%s944_s30 + $0x30] sm:$0xf] }
  0x1b   : > { %155 = vst [vmem:[%s123_s3 + $0x14] sm:$0xf] %v154_v5  ;;  %v158_v7 = vld [vmem:[%s944_s30 + $0x38] sm:$0xf]  ;;  %v160_v8 = vld [vmem:[%s944_s30 + $0x40] sm:$0xf] }
  0x1c   : > { %157 = vst [vmem:[%s123_s3 + $0x18] sm:$0xf] %v156_v6  ;;  %159 = vst [vmem:[%s123_s3 + $0x1c] sm:$0xf] %v158_v7  ;;  %v162_v9 = vld [vmem:[%s944_s30 + $0x48] sm:$0xf] }
  0x1d   : > { %161 = vst [vmem:[%s123_s3 + $0x20] sm:$0xf] %v160_v8  ;;  %v164_v10 = vld [vmem:[%s944_s30 + $0x50] sm:$0xf]  ;;  %v166_v11 = vld [vmem:[%s944_s30 + $0x58] sm:$0xf] }
  0x1e   : > { %163 = vst [vmem:[%s123_s3 + $0x24] sm:$0xf] %v162_v9  ;;  %165 = vst [vmem:[%s123_s3 + $0x28] sm:$0xf] %v164_v10  ;;  %v168_v12 = vld [vmem:[%s944_s30 + $0x60] sm:$0xf] }
  0x1f   : > { %167 = vst [vmem:[%s123_s3 + $0x2c] sm:$0xf] %v166_v11  ;;  %v170_v13 = vld [vmem:[%s944_s30 + $0x68] sm:$0xf]  ;;  %v172_v14 = vld [vmem:[%s944_s30 + $0x70] sm:$0xf] }
  0x20   : > { %169 = vst [vmem:[%s123_s3 + $0x30] sm:$0xf] %v168_v12  ;;  %171 = vst [vmem:[%s123_s3 + $0x34] sm:$0xf] %v170_v13  ;;  %v174_v15 = vld [vmem:[%s944_s30 + $0x78] sm:$0xf] }
  0x21   : > { %173 = vst [vmem:[%s123_s3 + $0x38] sm:$0xf] %v172_v14  ;;  %175 = vst [vmem:[%s123_s3 + $0x3c] sm:$0xf] %v174_v15 }
  0x22 PF: > { %p649_p7 = scmp.ge.s32.totalorder %s866_s15, 1  ;;  %p229_p8 = scmp.lt.s32.totalorder %s866_s15, 5 }
  0x24   : > { %p230_p9 = pnand %p649_p7, %p229_p8 }
  0x25   : > { %s236_s4 = sand.u32 (!%p230_p9), 1, %s842_s9   ;;  %s651_s5 = sshll.u32 (!%p230_p9), %s854_s12, 4 }
  0x26   : > { %233 = sbr.rel (%p230_p9) target bundleno = 319 (0x13f), region = 65  ;;  %s650_s6 = sshll.u32 (!%p230_p9), %s236_s4, 6 }
  0x27   : > { %p259_p10 = scmp.lt.s32.totalorder (!%p230_p9), %s651_s5, 31  ;;  %s971_s20 = scalar_lea.vmem (!%p230_p9), [#allocation2], %s650_s6 }
  0x28   : > { %p653_p11 = scmp.ne.s32.totalorder (!%p230_p9), %s850_s11, 0 }
  0x2d   : > { %s1081_s5 = smov (!%p259_p10, %s651_s5), 31  ;;  %268 = sbr.rel (%p653_p11) target bundleno = 56 (0x38), region = 73 }
  0x2e   : > { %s652_s7 = sshll.u32 %s1081_s5, 3  ;;  %v868_v16 = vmov (!%p653_p11), 0.0  }
  0x2f   : > { %s969_s19 = scalar_lea.vmem %s1067_s2, %s652_s7 }
  0x30   : > { %269 = vst [vmem:[%s969_s19] sm:$0xff] (!%p653_p11), %v868_v16  ;;  %270 = vst [vmem:[%s969_s19 + $0x8] sm:$0xff] (!%p653_p11), %v868_v16 }
  0x31   : > { %271 = vst [vmem:[%s969_s19 + $0x10] sm:$0xff] (!%p653_p11), %v868_v16  ;;  %272 = vst [vmem:[%s969_s19 + $0x18] sm:$0xff] (!%p653_p11), %v868_v16 }
  0x32   : > { %273 = vst [vmem:[%s969_s19 + $0x20] sm:$0xff] (!%p653_p11), %v868_v16  ;;  %274 = vst [vmem:[%s969_s19 + $0x28] sm:$0xff] (!%p653_p11), %v868_v16 }
  0x33   : > { %275 = vst [vmem:[%s969_s19 + $0x30] sm:$0xff] (!%p653_p11), %v868_v16  ;;  %276 = vst [vmem:[%s969_s19 + $0x38] sm:$0xff] (!%p653_p11), %v868_v16 }
  0x34   : > { %277 = vst [vmem:[%s969_s19 + $0x40] sm:$0xff] %v868_v16  ;;  %278 = vst [vmem:[%s969_s19 + $0x48] sm:$0xff] %v868_v16 }
  0x35   : > { %279 = vst [vmem:[%s969_s19 + $0x50] sm:$0xff] %v868_v16  ;;  %280 = vst [vmem:[%s969_s19 + $0x58] sm:$0xff] %v868_v16 }
  0x36   : > { %281 = vst [vmem:[%s969_s19 + $0x60] sm:$0xff] %v868_v16  ;;  %282 = vst [vmem:[%s969_s19 + $0x68] sm:$0xff] %v868_v16 }
  0x37   : > { %283 = vst [vmem:[%s969_s19 + $0x70] sm:$0xff] %v868_v16  ;;  %284 = vst [vmem:[%s969_s19 + $0x78] sm:$0xff] %v868_v16 }
  0x38 PF: > { %s654_s9 = sshll.u32 %s850_s11, 7  ;;  %v804_v17 = vld [vmem:[%s971_s20] sm:$0xff]   ;;  %v806_v27 = vld [vmem:[%s971_s20 + $0x8] sm:$0xff]   ;;  %v808_v29 = vld [vmem:[%s971_s20 + $0x10] sm:$0xff]  }
  0x39   : > { %s286_s12 = sshra.s32 %s654_s9, 3  ;;  %v805_v18 = vld [vmem:[%s971_s20 + $0x20] sm:$0xff]   ;;  %707 = vmatprep.mubr.bf16.mxu0 %v804_v17  ;;  %v807_v28 = vld [vmem:[%s971_s20 + $0x28] sm:$0xff]   ;;  %v809_v30 = vld [vmem:[%s971_s20 + $0x30] sm:$0xff]  }
  0x3a   : > { %s655_s21 = sshll.u32 %s286_s12, 2  ;;  %715 = vmatprep.mubr.bf16.mxu1 %v805_v18  ;;  %v810_v31 = vld [vmem:[%s971_s20 + $0x18] sm:$0xff]  }
  0x3b   : > { %s996_s25 = scalar_lea.vmem %s1066_s1, %s655_s21  ;;  %v811_v32 = vld [vmem:[%s971_s20 + $0x38] sm:$0xff]   ;;  %v306_v35 = vld [vmem:[%s969_s19] sm:$0xff]  ;;  %v307_v45 = vld [vmem:[%s969_s19 + $0x8] sm:$0xff] }
  0x3c   : > { %v796_v19 = vld [vmem:[%s996_s25] sm:$0xff]   ;;  %v797_v20 = vld [vmem:[%s996_s25 + $0x8] sm:$0xff]   ;;  %v798_v21 = vld [vmem:[%s996_s25 + $0x10] sm:$0xff]  }
  0x3d   : > { %691 = vmatprep.subr.bf16.mxu0 %v796_v19  ;;  %723 = vmatprep.subr.bf16.mxu1 %v796_v19  ;;  %v799_v22 = vld [vmem:[%s996_s25 + $0x18] sm:$0xff]   ;;  %v800_v23 = vld [vmem:[%s996_s25 + $0x20] sm:$0xff]   ;;  %v801_v24 = vld [vmem:[%s996_s25 + $0x28] sm:$0xff]  }
  0x3e   : > { %692 = vmatpush3.bf16.msra.mxu0 %v796_v19  ;;  %731 = vmatpush3.bf16.msra.mxu1 %v796_v19  ;;  %v802_v25 = vld [vmem:[%s996_s25 + $0x30] sm:$0xff]   ;;  %v803_v26 = vld [vmem:[%s996_s25 + $0x38] sm:$0xff]   ;;  %v310_v59 = vld [vmem:[%s969_s19 + $0x20] sm:$0xff] }
  0x3f   : > { %693 = vmatprep.subr.bf16.mxu0 %v797_v20  ;;  %724 = vmatprep.subr.bf16.mxu1 %v797_v20  ;;  %v308_v33 = vld [vmem:[%s969_s19 + $0x10] sm:$0xff]  ;;  %v314_v36 = vld [vmem:[%s969_s19 + $0x40] sm:$0xff]  ;;  %v309_v39 = vld [vmem:[%s969_s19 + $0x18] sm:$0xff] }
  0x40   : > { %v316_v34 = vld [vmem:[%s969_s19 + $0x50] sm:$0xff]  ;;  %v317_v40 = vld [vmem:[%s969_s19 + $0x58] sm:$0xff]  ;;  %v315_v46 = vld [vmem:[%s969_s19 + $0x48] sm:$0xff] }
  0x41   : > { %v312_v57 = vld [vmem:[%s969_s19 + $0x30] sm:$0xff]  ;;  %v318_v60 = vld [vmem:[%s969_s19 + $0x60] sm:$0xff]  ;;  %v313_v63 = vld [vmem:[%s969_s19 + $0x38] sm:$0xff] }
  0x42   : > { %694 = vmatpush3.bf16.msra.mxu0 %v797_v20  ;;  %732 = vmatpush3.bf16.msra.mxu1 %v797_v20  ;;  %v320_v58 = vld [vmem:[%s969_s19 + $0x70] sm:$0xff]  ;;  %v321_v0 = vld [vmem:[%s969_s19 + $0x78] sm:$0xff]  ;;  %v311_v5 = vld [vmem:[%s969_s19 + $0x28] sm:$0xff] }
  0x43   : > { %695 = vmatprep.subr.bf16.mxu0 %v798_v21  ;;  %725 = vmatprep.subr.bf16.mxu1 %v798_v21  ;;  %v319_v6 = vld [vmem:[%s969_s19 + $0x68] sm:$0xff] }
  0x46   : > { %696 = vmatpush3.bf16.msra.mxu0 %v798_v21  ;;  %733 = vmatpush3.bf16.msra.mxu1 %v798_v21 }
  0x47   : > { %697 = vmatprep.subr.bf16.mxu0 %v799_v22  ;;  %726 = vmatprep.subr.bf16.mxu1 %v799_v22 }
  0x4a   : > { %698 = vmatpush3.bf16.msra.mxu0 %v799_v22  ;;  %734 = vmatpush3.bf16.msra.mxu1 %v799_v22 }
  0x4b   : > { %699 = vmatprep.subr.bf16.mxu0 %v800_v23  ;;  %727 = vmatprep.subr.bf16.mxu1 %v800_v23 }
  0x4e   : > { %700 = vmatpush3.bf16.msra.mxu0 %v800_v23  ;;  %735 = vmatpush3.bf16.msra.mxu1 %v800_v23 }
  0x4f   : > { %701 = vmatprep.subr.bf16.mxu0 %v801_v24  ;;  %728 = vmatprep.subr.bf16.mxu1 %v801_v24 }
  0x52   : > { %702 = vmatpush3.bf16.msra.mxu0 %v801_v24  ;;  %736 = vmatpush3.bf16.msra.mxu1 %v801_v24 }
  0x53   : > { %703 = vmatprep.subr.bf16.mxu0 %v802_v25  ;;  %729 = vmatprep.subr.bf16.mxu1 %v802_v25 }
  0x56   : > { %704 = vmatpush3.bf16.msra.mxu0 %v802_v25  ;;  %737 = vmatpush3.bf16.msra.mxu1 %v802_v25 }
  0x57   : > { %705 = vmatprep.subr.bf16.mxu0 %v803_v26  ;;  %730 = vmatprep.subr.bf16.mxu1 %v803_v26 }
  0x5a   : > { %706 = vmatpush3.bf16.msra.mxu0 %v803_v26  ;;  %738 = vmatpush3.bf16.msra.mxu1 %v803_v26 }
  0x5d   : > { %708 = vmatmul.mubr.bf16.vlgmr.msra.gmra.mrb[0].mxu0 %v806_v27  ;;  %716 = vmatmul.mubr.bf16.vlgmr.msra.gmra.mrb[0].mxu1 %v807_v28 }
  0x5e   : > { %711 = vmatprep.mubr.bf16.mxu0 %v808_v29  ;;  %719 = vmatprep.mubr.bf16.mxu1 %v809_v30 }
  0x65   : > { %712 = vmatmul.mubr.bf16.gmra.mrb[4].mxu0 %v810_v31  ;;  %720 = vmatmul.mubr.bf16.gmra.mrb[4].mxu1 %v811_v32 }
 0x130   : > { %v709_v37 = vpop.f32.mrb[0].mxu0  ;;  %v717_v38 = vpop.f32.mrb[0].mxu1 }
 0x131   : > { %v533_v41 = vadd.f32 %v709_v37, %v308_v33  ;;  %v541_v42 = vadd.f32 %v717_v38, %v316_v34  ;;  %v468_v43 = vpop.f32.mrb[1].mxu0  ;;  %v500_v44 = vpop.f32.mrb[1].mxu1 }
 0x132   : > { %v531_v47 = vadd.f32 %v468_v43, %v306_v35  ;;  %v539_v48 = vadd.f32 %v500_v44, %v314_v36  ;;  %v710_v49 = vpop.f32.mrb[2].mxu0  ;;  %v718_v50 = vpop.f32.mrb[2].mxu1 }
 0x133   : > { %549 = vst [vmem:[%s969_s19 + $0x10] sm:$0xff] %v533_v41  ;;  %557 = vst [vmem:[%s969_s19 + $0x50] sm:$0xff] %v541_v42  ;;  %v534_v51 = vadd.f32 %v710_v49, %v309_v39  ;;  %v542_v52 = vadd.f32 %v718_v50, %v317_v40  ;;  %v471_v53 = vpop.f32.mrb[3].mxu0  ;;  %v503_v54 = vpop.f32.mrb[3].mxu1 }
 0x134   : > { %547 = vst [vmem:[%s969_s19] sm:$0xff] %v531_v47  ;;  %555 = vst [vmem:[%s969_s19 + $0x40] sm:$0xff] %v539_v48  ;;  %v532_v55 = vadd.f32 %v471_v53, %v307_v45  ;;  %v540_v56 = vadd.f32 %v503_v54, %v315_v46 }
 0x135   : > { %550 = vst [vmem:[%s969_s19 + $0x18] sm:$0xff] %v534_v51  ;;  %558 = vst [vmem:[%s969_s19 + $0x58] sm:$0xff] %v542_v52 }
 0x136   : > { %548 = vst [vmem:[%s969_s19 + $0x8] sm:$0xff] %v532_v55  ;;  %556 = vst [vmem:[%s969_s19 + $0x48] sm:$0xff] %v540_v56 }
 0x138   : > { %v713_v61 = vpop.f32.mrb[4].mxu0  ;;  %v721_v62 = vpop.f32.mrb[4].mxu1 }
 0x139   : > { %v537_v1 = vadd.f32 %v713_v61, %v312_v57  ;;  %v545_v2 = vadd.f32 %v721_v62, %v320_v58  ;;  %v484_v3 = vpop.f32.mrb[5].mxu0  ;;  %v516_v4 = vpop.f32.mrb[5].mxu1 }
 0x13a   : > { %v535_v7 = vadd.f32 %v484_v3, %v310_v59  ;;  %v543_v8 = vadd.f32 %v516_v4, %v318_v60  ;;  %v714_v9 = vpop.f32.mrb[6].mxu0  ;;  %v722_v10 = vpop.f32.mrb[6].mxu1 }
 0x13b   : > { %553 = vst [vmem:[%s969_s19 + $0x30] sm:$0xff] %v537_v1  ;;  %561 = vst [vmem:[%s969_s19 + $0x70] sm:$0xff] %v545_v2  ;;  %v538_v11 = vadd.f32 %v714_v9, %v313_v63  ;;  %v546_v12 = vadd.f32 %v722_v10, %v321_v0  ;;  %v487_v13 = vpop.f32.mrb[7].mxu0  ;;  %v519_v14 = vpop.f32.mrb[7].mxu1 }
 0x13c   : > { %551 = vst [vmem:[%s969_s19 + $0x20] sm:$0xff] %v535_v7  ;;  %559 = vst [vmem:[%s969_s19 + $0x60] sm:$0xff] %v543_v8  ;;  %v536_v15 = vadd.f32 %v487_v13, %v311_v5  ;;  %v544_v16 = vadd.f32 %v519_v14, %v319_v6 }
 0x13d   : > { %554 = vst [vmem:[%s969_s19 + $0x38] sm:$0xff] %v538_v11  ;;  %562 = vst [vmem:[%s969_s19 + $0x78] sm:$0xff] %v546_v12 }
 0x13e   : > { %552 = vst [vmem:[%s969_s19 + $0x28] sm:$0xff] %v536_v15  ;;  %560 = vst [vmem:[%s969_s19 + $0x68] sm:$0xff] %v544_v16 }
 0x13f PF: > { %s12_s15 = sadd.s32 1, %s866_s15   ;;  %s1068_s9 = smov %s846_s10 }
 0x140   : > { %p9_p12 = scmp.ge.s32.totalorder %s12_s15, 6   ;;  %s1069_s10 = smov %s935_s22 }
 0x141   : > { %s1070_s11 = smov %s858_s13  ;;  %s1071_s12 = smov %s862_s14 }
 0x142   : > { %s1072_s13 = smov %s1075_s16  ;;  %s1073_s14 = smov %s1079_s17 }
 0x143   :  { %11 = sbr.rel (!%p9_p12) target bundleno = 4 (0x4), region = 109 }

// kernel: gcn_forward.3
= control target key start
LH: loop header
LB: loop body
LE: loop exit
PB: predicated region body
PF: predicated region fallthrough
CT: control target
= control target key end

     0   :  { %s766_s12 = smov 0   ;;  %s837_s0 = inlined_call_operand.vmem [shape: bf16[256,128], index: 0, kind: input, shape index: {}]   ;;  %s838_s1 = inlined_call_operand.vmem [shape: bf16[128,128], index: 1, kind: input, shape index: {}]   ;;  %s839_s2 = inlined_call_operand.vmem [shape: f32[1,128], index: 2, kind: input, shape index: {}]   ;;  %s840_s3 = inlined_call_operand.vmem [shape: bf16[256,128], index: 3, kind: output, shape index: {}]  }
   0x1 LB: > { %s543_s13 = sadd.s32 4294967295, %s744_s12   ;;  %p547_p0 = scmp.ge.s32.totalorder %s744_s12, 1  ;;  %s744_s12 = sphi %s766_s12, %s13_s12  }
   0x2   : > { %p138_p1 = scmp.lt.s32.totalorder %s744_s12, 3 }
   0x4   : > { %p139_p2 = pnand %p547_p0, %p138_p1 }
   0x5   : > { %v722_v0 = vld [vmem:[%s838_s1] sm:$0xff] (!%p139_p2)   ;;  %s548_s16 = sshll.u32 (!%p139_p2), %s543_s13, 4  ;;  %v723_v1 = vld [vmem:[%s838_s1 + $0x8] sm:$0xff] (!%p139_p2)   ;;  %v724_v2 = vld [vmem:[%s838_s1 + $0x10] sm:$0xff] (!%p139_p2)  }
   0x6   : > { %142 = sbr.rel (%p139_p2) target bundleno = 298 (0x12a), region = 32  ;;  %p163_p3 = scmp.lt.s32.totalorder (!%p139_p2), %s548_s16, 31  ;;  %666 = vmatprep.subr.bf16.mxu0 (!%p139_p2), %v722_v0  ;;  %698 = vmatprep.subr.bf16.mxu1 (!%p139_p2), %v722_v0  ;;  %v725_v5 = vld [vmem:[%s838_s1 + $0x18] sm:$0xff] (!%p139_p2)   ;;  %v726_v6 = vld [vmem:[%s838_s1 + $0x20] sm:$0xff] (!%p139_p2)   ;;  %v727_v7 = vld [vmem:[%s838_s1 + $0x28] sm:$0xff] (!%p139_p2)  }
   0x7   : > { %667 = vmatpush3.bf16.xpose.msra.mxu0 (!%p139_p2), %v722_v0  ;;  %706 = vmatpush3.bf16.xpose.msra.mxu1 (!%p139_p2), %v722_v0  ;;  %v728_v8 = vld [vmem:[%s838_s1 + $0x30] sm:$0xff] (!%p139_p2)   ;;  %v729_v9 = vld [vmem:[%s838_s1 + $0x38] sm:$0xff] (!%p139_p2)   ;;  %v552_v17 = vld [vmem:[%s839_s2] ss:$0 sm:$0xff] (!%p139_p2) }
   0x8   : > { %668 = vmatprep.subr.bf16.mxu0 (!%p139_p2), %v723_v1  ;;  %699 = vmatprep.subr.bf16.mxu1 (!%p139_p2), %v723_v1 }
   0xd   : > { %s842_s16 = smov (!%p163_p3, %s548_s16), 31 }
   0xe   : > { %s549_s19 = sshll.u32 %s842_s16, 2 }
   0xf   : > { %s788_s22 = scalar_lea.vmem %s837_s0, %s549_s19  ;;  %669 = vmatpush3.bf16.xpose.msra.mxu0 %v723_v1  ;;  %707 = vmatpush3.bf16.xpose.msra.mxu1 %v723_v1  ;;  %s824_s13 = scalar_lea.vmem %s840_s3, %s549_s19 }
  0x10   : > { %v730_v3 = vld [vmem:[%s788_s22] sm:$0xff]   ;;  %670 = vmatprep.subr.bf16.mxu0 %v724_v2  ;;  %700 = vmatprep.subr.bf16.mxu1 %v724_v2  ;;  %v732_v10 = vld [vmem:[%s788_s22 + $0x8] sm:$0xff]   ;;  %v734_v12 = vld [vmem:[%s788_s22 + $0x10] sm:$0xff]  }
  0x11   : > { %v731_v4 = vld [vmem:[%s788_s22 + $0x20] sm:$0xff]   ;;  %682 = vmatprep.mubr.bf16.mxu0 %v730_v3  ;;  %v733_v11 = vld [vmem:[%s788_s22 + $0x28] sm:$0xff]   ;;  %v735_v13 = vld [vmem:[%s788_s22 + $0x30] sm:$0xff]  }
  0x12   : > { %690 = vmatprep.mubr.bf16.mxu1 %v731_v4  ;;  %v736_v14 = vld [vmem:[%s788_s22 + $0x18] sm:$0xff]  }
  0x13   : > { %v737_v15 = vld [vmem:[%s788_s22 + $0x38] sm:$0xff]  }
  0x17   : > { %671 = vmatpush3.bf16.xpose.msra.mxu0 %v724_v2  ;;  %708 = vmatpush3.bf16.xpose.msra.mxu1 %v724_v2 }
  0x18   : > { %672 = vmatprep.subr.bf16.mxu0 %v725_v5  ;;  %701 = vmatprep.subr.bf16.mxu1 %v725_v5 }
  0x1f   : > { %673 = vmatpush3.bf16.xpose.msra.mxu0 %v725_v5  ;;  %709 = vmatpush3.bf16.xpose.msra.mxu1 %v725_v5 }
  0x20   : > { %674 = vmatprep.subr.bf16.mxu0 %v726_v6  ;;  %702 = vmatprep.subr.bf16.mxu1 %v726_v6 }
  0x27   : > { %675 = vmatpush3.bf16.xpose.msra.mxu0 %v726_v6  ;;  %710 = vmatpush3.bf16.xpose.msra.mxu1 %v726_v6 }
  0x28   : > { %676 = vmatprep.subr.bf16.mxu0 %v727_v7  ;;  %703 = vmatprep.subr.bf16.mxu1 %v727_v7 }
  0x2f   : > { %677 = vmatpush3.bf16.xpose.msra.mxu0 %v727_v7  ;;  %711 = vmatpush3.bf16.xpose.msra.mxu1 %v727_v7 }
  0x30   : > { %678 = vmatprep.subr.bf16.mxu0 %v728_v8  ;;  %704 = vmatprep.subr.bf16.mxu1 %v728_v8 }
  0x37   : > { %679 = vmatpush3.bf16.xpose.msra.mxu0 %v728_v8  ;;  %712 = vmatpush3.bf16.xpose.msra.mxu1 %v728_v8 }
  0x38   : > { %680 = vmatprep.subr.bf16.mxu0 %v729_v9  ;;  %705 = vmatprep.subr.bf16.mxu1 %v729_v9 }
  0x3f   : > { %681 = vmatpush3.bf16.xpose.msra.mxu0 %v729_v9  ;;  %713 = vmatpush3.bf16.xpose.msra.mxu1 %v729_v9 }
  0x46   : > { %683 = vmatmul.mubr.bf16.vlgmr.msra.gmra.mrb[0].mxu0 %v732_v10  ;;  %691 = vmatmul.mubr.bf16.vlgmr.msra.gmra.mrb[0].mxu1 %v733_v11 }
  0x47   : > { %686 = vmatprep.mubr.bf16.mxu0 %v734_v12  ;;  %694 = vmatprep.mubr.bf16.mxu1 %v735_v13 }
  0x4e   : > { %687 = vmatmul.mubr.bf16.gmra.mrb[4].mxu0 %v736_v14  ;;  %695 = vmatmul.mubr.bf16.gmra.mrb[4].mxu1 %v737_v15 }
 0x119   : > { %v684_v16 = vpop.f32.mrb[0].mxu0  ;;  %v692_v18 = vpop.f32.mrb[0].mxu1 }
 0x11a   : > { %v344_v19 = vpop.f32.mrb[1].mxu0  ;;  %v376_v20 = vpop.f32.mrb[1].mxu1  ;;  %v353_v23 = vadd.f32 %v684_v16, %v552_v17  ;;  %v385_v24 = vadd.f32 %v692_v18, %v552_v17 }
 0x11b   : > { %v685_v21 = vpop.f32.mrb[2].mxu0  ;;  %v693_v22 = vpop.f32.mrb[2].mxu1  ;;  %v345_v29 = vadd.f32 %v552_v17, %v344_v19  ;;  %v377_v30 = vadd.f32 %v552_v17, %v376_v20 }
 0x11c   : > { %v356_v25 = vadd.f32 %v685_v21, %v552_v17  ;;  %v388_v26 = vadd.f32 %v693_v22, %v552_v17  ;;  %v347_v27 = vpop.f32.mrb[3].mxu0  ;;  %v379_v28 = vpop.f32.mrb[3].mxu1 }
 0x11d   : > { %v348_v31 = vadd.f32 %v552_v17, %v347_v27  ;;  %v380_v32 = vadd.f32 %v552_v17, %v379_v28 }
 0x11e   : > { %v611_v33 = vpack.c.bf16 %v356_v25, %v353_v23  ;;  %v631_v34 = vpack.c.bf16 %v388_v26, %v385_v24 }
 0x11f   : > { %v606_v35 = vpack.c.bf16 %v348_v31, %v345_v29  ;;  %v626_v36 = vpack.c.bf16 %v380_v32, %v377_v30 }
 0x120   : > { %643 = vst [vmem:[%s824_s13 + $0x8] sm:$0xff] %v611_v33   ;;  %647 = vst [vmem:[%s824_s13 + $0x28] sm:$0xff] %v631_v34  }
 0x121   : > { %607 = vst [vmem:[%s824_s13] sm:$0xff] %v606_v35   ;;  %646 = vst [vmem:[%s824_s13 + $0x20] sm:$0xff] %v626_v36   ;;  %v688_v37 = vpop.f32.mrb[4].mxu0  ;;  %v696_v38 = vpop.f32.mrb[4].mxu1 }
 0x122   : > { %v360_v39 = vpop.f32.mrb[5].mxu0  ;;  %v392_v40 = vpop.f32.mrb[5].mxu1  ;;  %v369_v43 = vadd.f32 %v688_v37, %v552_v17  ;;  %v401_v44 = vadd.f32 %v696_v38, %v552_v17 }
 0x123   : > { %v689_v41 = vpop.f32.mrb[6].mxu0  ;;  %v697_v42 = vpop.f32.mrb[6].mxu1  ;;  %v361_v49 = vadd.f32 %v552_v17, %v360_v39  ;;  %v393_v50 = vadd.f32 %v552_v17, %v392_v40 }
 0x124   : > { %v372_v45 = vadd.f32 %v689_v41, %v552_v17  ;;  %v404_v46 = vadd.f32 %v697_v42, %v552_v17  ;;  %v363_v47 = vpop.f32.mrb[7].mxu0  ;;  %v395_v48 = vpop.f32.mrb[7].mxu1 }
 0x125   : > { %v364_v51 = vadd.f32 %v552_v17, %v363_v47  ;;  %v396_v52 = vadd.f32 %v552_v17, %v395_v48 }
 0x126   : > { %v621_v53 = vpack.c.bf16 %v372_v45, %v369_v43  ;;  %v641_v54 = vpack.c.bf16 %v404_v46, %v401_v44 }
 0x127   : > { %v616_v55 = vpack.c.bf16 %v364_v51, %v361_v49  ;;  %v636_v56 = vpack.c.bf16 %v396_v52, %v393_v50 }
 0x128   : > { %645 = vst [vmem:[%s824_s13 + $0x18] sm:$0xff] %v621_v53   ;;  %649 = vst [vmem:[%s824_s13 + $0x38] sm:$0xff] %v641_v54  }
 0x129   : > { %644 = vst [vmem:[%s824_s13 + $0x10] sm:$0xff] %v616_v55   ;;  %648 = vst [vmem:[%s824_s13 + $0x30] sm:$0xff] %v636_v56  }
 0x12a PF: > { %s13_s12 = sadd.s32 1, %s744_s12  }
 0x12b   : > { %p10_p4 = scmp.ge.s32.totalorder %s13_s12, 4  }
 0x12d   :  { %12 = sbr.rel (!%p10_p4) target bundleno = 1 (0x1), region = 62 }

// kernel: gcn_forward.4
= control target key start
LH: loop header
LB: loop body
LE: loop exit
PB: predicated region body
PF: predicated region fallthrough
CT: control target
= control target key end

     0   :  { %s1401_s15 = smov 0   ;;  %s1403_s16 = smov 0   ;;  %s1570_s0 = inlined_call_operand.vmem [shape: bf16[256,256], index: 0, kind: input, shape index: {}]   ;;  %s1571_s1 = inlined_call_operand.vmem [shape: bf16[256,128], index: 1, kind: input, shape index: {}]   ;;  %s1572_s2 = inlined_call_operand.vmem [shape: bf16[128,128], index: 2, kind: input, shape index: {}]   ;;  %s1573_s3 = inlined_call_operand.vmem [shape: f32[1,128], index: 3, kind: input, shape index: {}]   ;;  %s1574_s4 = inlined_call_operand.vmem [shape: bf16[256,128], index: 4, kind: output, shape index: {}]  }
   0x1   :  { %s1405_s17 = smov 0   ;;  %s1407_s18 = smov 0  }
   0x2   :  { %s1409_s19 = smov 0   ;;  %s1411_s20 = smov 0  }
   0x3   :  { %s1413_s21 = smov 0  }
   0x4 LB: > { %s23_s22 = sadd.s32 1, %s1365_s19  ;;  %s26_s23 = sadd.s32 1, %s1369_s20  ;;  %s1373_s21 = sphi %s1413_s21, %s14_s21   ;;  %s1369_s20 = sphi %s1411_s20, %s1580_s20   ;;  %s1365_s19 = sphi %s1409_s19, %s1579_s19   ;;  %s1361_s18 = sphi %s1407_s18, %s1578_s18   ;;  %s1357_s17 = sphi %s1405_s17, %s1577_s17   ;;  %s1353_s16 = sphi %s1403_s16, %s1576_s16   ;;  %s1349_s15 = sphi %s1401_s15, %s1575_s15  }
   0x5   : > { %p24_p0 = scmp.ge.s32.totalorder %s23_s22, 2  ;;  %p42_p1 = scmp.ne.s32.totalorder %s1353_s16, %s1349_s15 }
   0x6   : > { %p43_p2 = scmp.eq.s32.totalorder %s1373_s21, 0  ;;  %s35_s27 = sadd.s32 1, %s1353_s16 }
   0x7   : > { %s1582_s22 = smov (%p24_p0, %s23_s22), 0  ;;  %s1584_s23 = smov (!%p24_p0, %s26_s23), %s1369_s20 }
   0x8   : > { %p44_p3 = por %p43_p2, %p42_p1  ;;  %p28_p4 = scmp.ge.s32.totalorder %s1584_s23, 2 }
   0x9   : > { %s31_s24 = ssub.s32 %s1365_s19, %s1582_s22  ;;  %p990_p6 = scmp.ge.s32.totalorder %s1373_s21, 4 }
   0xa   : > { %s1586_s23 = smov (%p28_p4, %s1584_s23), 0 }
   0xb   : > { %s30_s25 = ssub.s32 %s1369_s20, %s1586_s23  ;;  %166 = sbr.rel (%p990_p6) target bundleno = 34 (0x22), region = 28 }
   0xc   : > { %s32_s26 = sor.u32 %s31_s24, %s30_s25 }
   0xd   : > { %p33_p5 = scmp.eq.s32.totalorder %s32_s26, 0 }
   0xf   : > { %s1452_s28 = scalar_select %p33_p5, %s1353_s16, %s35_s27  }
  0x12   : > { %169 = sbr.rel (!%p44_p3) target bundleno = 34 (0x22), region = 32  ;;  %s171_s29 = sand.u32 (%p44_p3), 1, %s1353_s16  }
  0x13   : > { %s1046_s30 = sshll.u32 (%p44_p3), %s1369_s20, 5  ;;  %s991_s5 = sshll.u32 (%p44_p3), %s171_s29, 6 }
  0x14   : > { %s176_s6 = sadd.s32 (%p44_p3), %s1365_s19, %s1046_s30  ;;  %s173_s11 = scalar_lea.vmem (%p44_p3), [#allocation3], %s991_s5 }
  0x15   : > { %s994_s7 = sshll.u32 (%p44_p3), %s176_s6, 2 }
  0x16   : > { %s1461_s10 = scalar_lea.vmem (%p44_p3), %s1570_s0, %s994_s7 }
  0x17   : > { %v194_v0 = vld [vmem:[%s1461_s10] sm:$0xf] (%p44_p3)  ;;  %v196_v1 = vld [vmem:[%s1461_s10 + $0x8] sm:$0xf] (%p44_p3)  ;;  %v198_v2 = vld [vmem:[%s1461_s10 + $0x10] sm:$0xf] (%p44_p3) }
  0x18   : > { %195 = vst [vmem:[%s173_s11] sm:$0xf] (%p44_p3), %v194_v0  ;;  %197 = vst [vmem:[%s173_s11 + $0x4] sm:$0xf] (%p44_p3), %v196_v1  ;;  %v200_v3 = vld [vmem:[%s1461_s10 + $0x18] sm:$0xf] (%p44_p3) }
  0x19   : > { %199 = vst [vmem:[%s173_s11 + $0x8] sm:$0xf] %v198_v2  ;;  %v202_v4 = vld [vmem:[%s1461_s10 + $0x20] sm:$0xf]  ;;  %v204_v5 = vld [vmem:[%s1461_s10 + $0x28] sm:$0xf] }
  0x1a   : > { %201 = vst [vmem:[%s173_s11 + $0xc] sm:$0xf] %v200_v3  ;;  %203 = vst [vmem:[%s173_s11 + $0x10] sm:$0xf] %v202_v4  ;;  %v206_v6 = vld [vmem:[%s1461_s10 + $0x30] sm:$0xf] }
  0x1b   : > { %205 = vst [vmem:[%s173_s11 + $0x14] sm:$0xf] %v204_v5  ;;  %v208_v7 = vld [vmem:[%s1461_s10 + $0x38] sm:$0xf]  ;;  %v210_v8 = vld [vmem:[%s1461_s10 + $0x40] sm:$0xf] }
  0x1c   : > { %207 = vst [vmem:[%s173_s11 + $0x18] sm:$0xf] %v206_v6  ;;  %209 = vst [vmem:[%s173_s11 + $0x1c] sm:$0xf] %v208_v7  ;;  %v212_v9 = vld [vmem:[%s1461_s10 + $0x48] sm:$0xf] }
  0x1d   : > { %211 = vst [vmem:[%s173_s11 + $0x20] sm:$0xf] %v210_v8  ;;  %v214_v10 = vld [vmem:[%s1461_s10 + $0x50] sm:$0xf]  ;;  %v216_v11 = vld [vmem:[%s1461_s10 + $0x58] sm:$0xf] }
  0x1e   : > { %213 = vst [vmem:[%s173_s11 + $0x24] sm:$0xf] %v212_v9  ;;  %215 = vst [vmem:[%s173_s11 + $0x28] sm:$0xf] %v214_v10  ;;  %v218_v12 = vld [vmem:[%s1461_s10 + $0x60] sm:$0xf] }
  0x1f   : > { %217 = vst [vmem:[%s173_s11 + $0x2c] sm:$0xf] %v216_v11  ;;  %v220_v13 = vld [vmem:[%s1461_s10 + $0x68] sm:$0xf]  ;;  %v222_v14 = vld [vmem:[%s1461_s10 + $0x70] sm:$0xf] }
  0x20   : > { %219 = vst [vmem:[%s173_s11 + $0x30] sm:$0xf] %v218_v12  ;;  %221 = vst [vmem:[%s173_s11 + $0x34] sm:$0xf] %v220_v13  ;;  %v224_v15 = vld [vmem:[%s1461_s10 + $0x78] sm:$0xf] }
  0x21   : > { %223 = vst [vmem:[%s173_s11 + $0x38] sm:$0xf] %v222_v14  ;;  %225 = vst [vmem:[%s173_s11 + $0x3c] sm:$0xf] %v224_v15 }
  0x22 PF: > { %p995_p7 = scmp.ge.s32.totalorder %s1373_s21, 1  ;;  %p279_p8 = scmp.lt.s32.totalorder %s1373_s21, 5 }
  0x24   : > { %p280_p9 = pnand %p995_p7, %p279_p8 }
  0x25   : > { %s286_s12 = sand.u32 (!%p280_p9), 1, %s1349_s15   ;;  %s997_s13 = sshll.u32 (!%p280_p9), %s1361_s18, 4 }
  0x26   : > { %283 = sbr.rel (%p280_p9) target bundleno = 551 (0x227), region = 73  ;;  %s996_s14 = sshll.u32 (!%p280_p9), %s286_s12, 6 }
  0x27   : > { %p313_p10 = scmp.lt.s32.totalorder (!%p280_p9), %s997_s13, 31  ;;  %s1488_s29 = scalar_lea.vmem (!%p280_p9), [#allocation3], %s996_s14 }
  0x28   : > { %p999_p11 = scmp.ne.s32.totalorder (!%p280_p9), %s1357_s17, 0 }
  0x2d   : > { %s1588_s13 = smov (!%p313_p10, %s997_s13), 31  ;;  %322 = sbr.rel (%p999_p11) target bundleno = 55 (0x37), region = 81 }
  0x2e   : > { %s998_s24 = sshll.u32 %s1588_s13, 2  ;;  %v1375_v16 = vmov (!%p999_p11), 0.0  }
  0x2f   : > { %s1486_s27 = scalar_lea.vmem %s1574_s4, %s998_s24  ;;  %323 = vst [vmem:[#allocation2] sm:$0xff] (!%p999_p11), %v1375_v16  ;;  %324 = vst [vmem:[#allocation2 + $0x8] sm:$0xff] (!%p999_p11), %v1375_v16 }
  0x30   : > { %325 = vst [vmem:[#allocation2 + $0x10] sm:$0xff] (!%p999_p11), %v1375_v16  ;;  %326 = vst [vmem:[#allocation2 + $0x18] sm:$0xff] (!%p999_p11), %v1375_v16 }
  0x31   : > { %327 = vst [vmem:[#allocation2 + $0x20] sm:$0xff] (!%p999_p11), %v1375_v16  ;;  %328 = vst [vmem:[#allocation2 + $0x28] sm:$0xff] (!%p999_p11), %v1375_v16 }
  0x32   : > { %329 = vst [vmem:[#allocation2 + $0x30] sm:$0xff] (!%p999_p11), %v1375_v16  ;;  %330 = vst [vmem:[#allocation2 + $0x38] sm:$0xff] (!%p999_p11), %v1375_v16 }
  0x33   : > { %331 = vst [vmem:[#allocation2 + $0x40] sm:$0xff] (!%p999_p11), %v1375_v16  ;;  %332 = vst [vmem:[#allocation2 + $0x48] sm:$0xff] (!%p999_p11), %v1375_v16 }
  0x34   : > { %333 = vst [vmem:[#allocation2 + $0x50] sm:$0xff] %v1375_v16  ;;  %334 = vst [vmem:[#allocation2 + $0x58] sm:$0xff] %v1375_v16 }
  0x35   : > { %335 = vst [vmem:[#allocation2 + $0x60] sm:$0xff] %v1375_v16  ;;  %336 = vst [vmem:[#allocation2 + $0x68] sm:$0xff] %v1375_v16 }
  0x36   : > { %337 = vst [vmem:[#allocation2 + $0x70] sm:$0xff] %v1375_v16  ;;  %338 = vst [vmem:[#allocation2 + $0x78] sm:$0xff] %v1375_v16 }
  0x37 PF: > { %s1000_s15 = sshll.u32 %s1357_s17, 7  ;;  %v1303_v17 = vld [vmem:[%s1488_s29] sm:$0xff]   ;;  %v1305_v27 = vld [vmem:[%s1488_s29 + $0x8] sm:$0xff]   ;;  %v1307_v29 = vld [vmem:[%s1488_s29 + $0x10] sm:$0xff]   ;;  %p1018_p12 = scmp.ne.s32.totalorder %s1357_s17, 1 }
  0x38   : > { %s340_s18 = sshra.s32 %s1000_s15, 3  ;;  %v1304_v18 = vld [vmem:[%s1488_s29 + $0x20] sm:$0xff]   ;;  %1158 = vmatprep.mubr.bf16.mxu0 %v1303_v17  ;;  %v1306_v28 = vld [vmem:[%s1488_s29 + $0x28] sm:$0xff]   ;;  %v1308_v30 = vld [vmem:[%s1488_s29 + $0x30] sm:$0xff]  }
  0x39   : > { %s1001_s30 = sshll.u32 %s340_s18, 2  ;;  %1166 = vmatprep.mubr.bf16.mxu1 %v1304_v18  ;;  %v1309_v31 = vld [vmem:[%s1488_s29 + $0x18] sm:$0xff]   ;;  %v360_v35 = vld [vmem:[#allocation2] sm:$0xff]  ;;  %v361_v45 = vld [vmem:[#allocation2 + $0x8] sm:$0xff] }
  0x3a   : > { %s1497_s7 = scalar_lea.vmem %s1571_s1, %s1001_s30  ;;  %v1310_v32 = vld [vmem:[%s1488_s29 + $0x38] sm:$0xff]   ;;  %v362_v33 = vld [vmem:[#allocation2 + $0x10] sm:$0xff]  ;;  %v1311_v17 = vld [vmem:[%s1572_s2] sm:$0xff] (!%p1018_p12)  }
  0x3b   : > { %v1295_v19 = vld [vmem:[%s1497_s7] sm:$0xff]   ;;  %v1296_v20 = vld [vmem:[%s1497_s7 + $0x8] sm:$0xff]   ;;  %v1297_v21 = vld [vmem:[%s1497_s7 + $0x10] sm:$0xff]  }
  0x3c   : > { %1142 = vmatprep.subr.bf16.mxu0 %v1295_v19  ;;  %1206 = vmatprep.subr.bf16.mxu1 %v1295_v19  ;;  %v1298_v22 = vld [vmem:[%s1497_s7 + $0x18] sm:$0xff]   ;;  %v1299_v23 = vld [vmem:[%s1497_s7 + $0x20] sm:$0xff]   ;;  %v1300_v24 = vld [vmem:[%s1497_s7 + $0x28] sm:$0xff]  }
  0x3d   : > { %1143 = vmatpush3.bf16.msra.mxu0 %v1295_v19  ;;  %1214 = vmatpush3.bf16.msra.mxu1 %v1295_v19  ;;  %v1301_v25 = vld [vmem:[%s1497_s7 + $0x30] sm:$0xff]   ;;  %v1302_v26 = vld [vmem:[%s1497_s7 + $0x38] sm:$0xff]   ;;  %v368_v36 = vld [vmem:[#allocation2 + $0x40] sm:$0xff] }
  0x3e   : > { %1144 = vmatprep.subr.bf16.mxu0 %v1296_v20  ;;  %1207 = vmatprep.subr.bf16.mxu1 %v1296_v20  ;;  %v370_v34 = vld [vmem:[#allocation2 + $0x50] sm:$0xff]  ;;  %v363_v39 = vld [vmem:[#allocation2 + $0x18] sm:$0xff]  ;;  %v369_v46 = vld [vmem:[#allocation2 + $0x48] sm:$0xff] }
  0x3f   : > { %v371_v40 = vld [vmem:[#allocation2 + $0x58] sm:$0xff]  ;;  %v366_v57 = vld [vmem:[#allocation2 + $0x30] sm:$0xff]  ;;  %v364_v59 = vld [vmem:[#allocation2 + $0x20] sm:$0xff] }
  0x40   : > { %v374_v58 = vld [vmem:[#allocation2 + $0x70] sm:$0xff]  ;;  %v372_v60 = vld [vmem:[#allocation2 + $0x60] sm:$0xff]  ;;  %v367_v63 = vld [vmem:[#allocation2 + $0x38] sm:$0xff] }
  0x41   : > { %1145 = vmatpush3.bf16.msra.mxu0 %v1296_v20  ;;  %1215 = vmatpush3.bf16.msra.mxu1 %v1296_v20  ;;  %v375_v0 = vld [vmem:[#allocation2 + $0x78] sm:$0xff]  ;;  %v365_v5 = vld [vmem:[#allocation2 + $0x28] sm:$0xff]  ;;  %v1313_v19 = vld [vmem:[%s1572_s2 + $0x10] sm:$0xff] (!%p1018_p12)  }
  0x42   : > { %1146 = vmatprep.subr.bf16.mxu0 %v1297_v21  ;;  %1208 = vmatprep.subr.bf16.mxu1 %v1297_v21  ;;  %v373_v6 = vld [vmem:[#allocation2 + $0x68] sm:$0xff] }
  0x43   : > { %v1312_v18 = vld [vmem:[%s1572_s2 + $0x8] sm:$0xff] (!%p1018_p12)  }
  0x45   : > { %1147 = vmatpush3.bf16.msra.mxu0 %v1297_v21  ;;  %1216 = vmatpush3.bf16.msra.mxu1 %v1297_v21 }
  0x46   : > { %1148 = vmatprep.subr.bf16.mxu0 %v1298_v22  ;;  %1209 = vmatprep.subr.bf16.mxu1 %v1298_v22 }
  0x49   : > { %1149 = vmatpush3.bf16.msra.mxu0 %v1298_v22  ;;  %1217 = vmatpush3.bf16.msra.mxu1 %v1298_v22 }
  0x4a   : > { %1150 = vmatprep.subr.bf16.mxu0 %v1299_v23  ;;  %1210 = vmatprep.subr.bf16.mxu1 %v1299_v23 }
  0x4d   : > { %1151 = vmatpush3.bf16.msra.mxu0 %v1299_v23  ;;  %1218 = vmatpush3.bf16.msra.mxu1 %v1299_v23 }
  0x4e   : > { %1152 = vmatprep.subr.bf16.mxu0 %v1300_v24  ;;  %1211 = vmatprep.subr.bf16.mxu1 %v1300_v24 }
  0x51   : > { %1153 = vmatpush3.bf16.msra.mxu0 %v1300_v24  ;;  %1219 = vmatpush3.bf16.msra.mxu1 %v1300_v24 }
  0x52   : > { %1154 = vmatprep.subr.bf16.mxu0 %v1301_v25  ;;  %1212 = vmatprep.subr.bf16.mxu1 %v1301_v25 }
  0x55   : > { %1155 = vmatpush3.bf16.msra.mxu0 %v1301_v25  ;;  %1220 = vmatpush3.bf16.msra.mxu1 %v1301_v25 }
  0x56   : > { %1156 = vmatprep.subr.bf16.mxu0 %v1302_v26  ;;  %1213 = vmatprep.subr.bf16.mxu1 %v1302_v26 }
  0x59   : > { %1157 = vmatpush3.bf16.msra.mxu0 %v1302_v26  ;;  %1221 = vmatpush3.bf16.msra.mxu1 %v1302_v26 }
  0x5a   : > { %1174 = vmatprep.subr.bf16.mxu0 (!%p1018_p12), %v1311_v17  ;;  %1222 = vmatprep.subr.bf16.mxu1 (!%p1018_p12), %v1311_v17 }
  0x5c   : > { %1159 = vmatmul.mubr.bf16.vlgmr.msra.gmra.mrb[0].mxu0 %v1305_v27  ;;  %1167 = vmatmul.mubr.bf16.vlgmr.msra.gmra.mrb[0].mxu1 %v1306_v28 }
  0x5d   : > { %1162 = vmatprep.mubr.bf16.mxu0 %v1307_v29  ;;  %1170 = vmatprep.mubr.bf16.mxu1 %v1308_v30  ;;  %v1314_v30 = vld [vmem:[%s1572_s2 + $0x18] sm:$0xff] (!%p1018_p12)  }
  0x62   : > { %1175 = vmatpush3.bf16.xpose.msra.mxu0 (!%p1018_p12), %v1311_v17  ;;  %1230 = vmatpush3.bf16.xpose.msra.mxu1 (!%p1018_p12), %v1311_v17 }
  0x63   : > { %1176 = vmatprep.subr.bf16.mxu0 (!%p1018_p12), %v1312_v18  ;;  %1223 = vmatprep.subr.bf16.mxu1 (!%p1018_p12), %v1312_v18 }
  0x64   : > { %1163 = vmatmul.mubr.bf16.gmra.mrb[4].mxu0 %v1309_v31  ;;  %1171 = vmatmul.mubr.bf16.gmra.mrb[4].mxu1 %v1310_v32  ;;  %v1315_v31 = vld [vmem:[%s1572_s2 + $0x20] sm:$0xff] (!%p1018_p12)   ;;  %v1316_v32 = vld [vmem:[%s1572_s2 + $0x28] sm:$0xff] (!%p1018_p12)  }
  0x6a   : > { %1177 = vmatpush3.bf16.xpose.msra.mxu0 (!%p1018_p12), %v1312_v18  ;;  %1231 = vmatpush3.bf16.xpose.msra.mxu1 (!%p1018_p12), %v1312_v18 }
  0x6b   : > { %1178 = vmatprep.subr.bf16.mxu0 (!%p1018_p12), %v1313_v19  ;;  %1224 = vmatprep.subr.bf16.mxu1 (!%p1018_p12), %v1313_v19 }
  0x72   : > { %1179 = vmatpush3.bf16.xpose.msra.mxu0 (!%p1018_p12), %v1313_v19  ;;  %1232 = vmatpush3.bf16.xpose.msra.mxu1 (!%p1018_p12), %v1313_v19 }
  0x73   : > { %1180 = vmatprep.subr.bf16.mxu0 (!%p1018_p12), %v1314_v30  ;;  %1225 = vmatprep.subr.bf16.mxu1 (!%p1018_p12), %v1314_v30 }
  0x7a   : > { %1181 = vmatpush3.bf16.xpose.msra.mxu0 (!%p1018_p12), %v1314_v30  ;;  %1233 = vmatpush3.bf16.xpose.msra.mxu1 (!%p1018_p12), %v1314_v30 }
  0x7b   : > { %1182 = vmatprep.subr.bf16.mxu0 (!%p1018_p12), %v1315_v31  ;;  %1226 = vmatprep.subr.bf16.mxu1 (!%p1018_p12), %v1315_v31 }
  0x82   : > { %1183 = vmatpush3.bf16.xpose.msra.mxu0 (!%p1018_p12), %v1315_v31  ;;  %1234 = vmatpush3.bf16.xpose.msra.mxu1 (!%p1018_p12), %v1315_v31 }
  0x83   : > { %1184 = vmatprep.subr.bf16.mxu0 (!%p1018_p12), %v1316_v32  ;;  %1227 = vmatprep.subr.bf16.mxu1 (!%p1018_p12), %v1316_v32 }
  0x8a   : > { %1185 = vmatpush3.bf16.xpose.msra.mxu0 (!%p1018_p12), %v1316_v32  ;;  %1235 = vmatpush3.bf16.xpose.msra.mxu1 (!%p1018_p12), %v1316_v32 }
 0x12f   : > { %v1160_v37 = vpop.f32.mrb[0].mxu0  ;;  %v1168_v38 = vpop.f32.mrb[0].mxu1 }
 0x130   : > { %v587_v41 = vadd.f32 %v1160_v37, %v362_v33  ;;  %v595_v42 = vadd.f32 %v1168_v38, %v370_v34  ;;  %v522_v43 = vpop.f32.mrb[1].mxu0  ;;  %v554_v44 = vpop.f32.mrb[1].mxu1  ;;  %v1317_v33 = vld [vmem:[%s1572_s2 + $0x30] sm:$0xff] (!%p1018_p12)   ;;  %v1318_v34 = vld [vmem:[%s1572_s2 + $0x38] sm:$0xff] (!%p1018_p12)  }
 0x131   : > { %v585_v47 = vadd.f32 %v522_v43, %v360_v35  ;;  %v593_v48 = vadd.f32 %v554_v44, %v368_v36  ;;  %v1161_v49 = vpop.f32.mrb[2].mxu0  ;;  %v1169_v50 = vpop.f32.mrb[2].mxu1  ;;  %1186 = vmatprep.subr.bf16.mxu0 (!%p1018_p12), %v1317_v33  ;;  %1228 = vmatprep.subr.bf16.mxu1 (!%p1018_p12), %v1317_v33 }
 0x132   : > { %603 = vst [vmem:[#allocation2 + $0x10] sm:$0xff] %v587_v41  ;;  %611 = vst [vmem:[#allocation2 + $0x50] sm:$0xff] %v595_v42  ;;  %v588_v51 = vadd.f32 %v1161_v49, %v363_v39  ;;  %v596_v52 = vadd.f32 %v1169_v50, %v371_v40  ;;  %v525_v53 = vpop.f32.mrb[3].mxu0  ;;  %v557_v54 = vpop.f32.mrb[3].mxu1  ;;  %1187 = vmatpush3.bf16.xpose.msra.mxu0 (!%p1018_p12), %v1317_v33  ;;  %1236 = vmatpush3.bf16.xpose.msra.mxu1 (!%p1018_p12), %v1317_v33 }
 0x133   : > { %601 = vst [vmem:[#allocation2] sm:$0xff] %v585_v47  ;;  %609 = vst [vmem:[#allocation2 + $0x40] sm:$0xff] %v593_v48  ;;  %v586_v55 = vadd.f32 %v525_v53, %v361_v45  ;;  %v594_v56 = vadd.f32 %v557_v54, %v369_v46  ;;  %1188 = vmatprep.subr.bf16.mxu0 (!%p1018_p12), %v1318_v34  ;;  %1229 = vmatprep.subr.bf16.mxu1 (!%p1018_p12), %v1318_v34 }
 0x134   : > { %604 = vst [vmem:[#allocation2 + $0x18] sm:$0xff] %v588_v51  ;;  %612 = vst [vmem:[#allocation2 + $0x58] sm:$0xff] %v596_v52 }
 0x135   : > { %602 = vst [vmem:[#allocation2 + $0x8] sm:$0xff] %v586_v55  ;;  %610 = vst [vmem:[#allocation2 + $0x48] sm:$0xff] %v594_v56 }
 0x137   : > { %v1164_v61 = vpop.f32.mrb[4].mxu0  ;;  %v1172_v62 = vpop.f32.mrb[4].mxu1  ;;  %620 = sbr.rel (%p1018_p12) target bundleno = 551 (0x227), region = 85 }
 0x138   : > { %v591_v1 = vadd.f32 %v1164_v61, %v366_v57  ;;  %v599_v2 = vadd.f32 %v1172_v62, %v374_v58  ;;  %v538_v3 = vpop.f32.mrb[5].mxu0  ;;  %v570_v4 = vpop.f32.mrb[5].mxu1 }
 0x139   : > { %v589_v7 = vadd.f32 %v538_v3, %v364_v59  ;;  %v597_v8 = vadd.f32 %v570_v4, %v372_v60  ;;  %v1165_v9 = vpop.f32.mrb[6].mxu0  ;;  %v1173_v10 = vpop.f32.mrb[6].mxu1  ;;  %v623_v35 = vld [vmem:[#allocation2 + $0x10] sm:$0xff] (!%p1018_p12) }
 0x13a   : > { %607 = vst [vmem:[#allocation2 + $0x30] sm:$0xff] %v591_v1  ;;  %615 = vst [vmem:[#allocation2 + $0x70] sm:$0xff] %v599_v2  ;;  %v592_v11 = vadd.f32 %v1165_v9, %v367_v63  ;;  %v600_v12 = vadd.f32 %v1173_v10, %v375_v0  ;;  %v541_v13 = vpop.f32.mrb[7].mxu0  ;;  %v573_v14 = vpop.f32.mrb[7].mxu1  ;;  %v621_v20 = vld [vmem:[#allocation2] sm:$0xff] (!%p1018_p12)  ;;  %v631_v37 = vld [vmem:[#allocation2 + $0x50] sm:$0xff] (!%p1018_p12)  ;;  %1189 = vmatpush3.bf16.xpose.msra.mxu0 (!%p1018_p12), %v1318_v34  ;;  %1237 = vmatpush3.bf16.xpose.msra.mxu1 (!%p1018_p12), %v1318_v34 }
 0x13b   : > { %605 = vst [vmem:[#allocation2 + $0x20] sm:$0xff] %v589_v7  ;;  %613 = vst [vmem:[#allocation2 + $0x60] sm:$0xff] %v597_v8  ;;  %v590_v15 = vadd.f32 %v541_v13, %v365_v5  ;;  %v598_v16 = vadd.f32 %v573_v14, %v373_v6  ;;  %v629_v22 = vld [vmem:[#allocation2 + $0x40] sm:$0xff] (!%p1018_p12)  ;;  %v637_v23 = vmax.f32 (!%p1018_p12), %v621_v20, 0.0  ;;  %v624_v36 = vld [vmem:[#allocation2 + $0x18] sm:$0xff] (!%p1018_p12)  ;;  %v639_v43 = vmax.f32 (!%p1018_p12), %v623_v35, 0.0 }
 0x13c   : > { %608 = vst [vmem:[#allocation2 + $0x38] sm:$0xff] %v592_v11  ;;  %616 = vst [vmem:[#allocation2 + $0x78] sm:$0xff] %v600_v12  ;;  %v622_v21 = vld [vmem:[#allocation2 + $0x8] sm:$0xff] (!%p1018_p12)  ;;  %v645_v26 = vmax.f32 (!%p1018_p12), %v629_v22, 0.0  ;;  %v632_v38 = vld [vmem:[#allocation2 + $0x58] sm:$0xff] (!%p1018_p12)  ;;  %v640_v44 = vmax.f32 (!%p1018_p12), %v624_v36, 0.0 }
 0x13d   : > { %606 = vst [vmem:[#allocation2 + $0x28] sm:$0xff] %v590_v15  ;;  %614 = vst [vmem:[#allocation2 + $0x68] sm:$0xff] %v598_v16  ;;  %v638_v24 = vmax.f32 (!%p1018_p12), %v622_v21, 0.0  ;;  %v630_v25 = vld [vmem:[#allocation2 + $0x48] sm:$0xff] (!%p1018_p12)  ;;  %v647_v45 = vmax.f32 (!%p1018_p12), %v631_v37, 0.0  ;;  %v648_v46 = vmax.f32 (!%p1018_p12), %v632_v38, 0.0 }
 0x13e   : > { %v646_v27 = vmax.f32 %v630_v25, 0.0  ;;  %v654_v51 = vpack.c.bf16 %v640_v44, %v639_v43  ;;  %v1019_v2 = vld [vmem:[%s1573_s3] ss:$0 sm:$0xff] }
 0x13f   : > { %v653_v28 = vpack.c.bf16 %v638_v24, %v637_v23  ;;  %v658_v52 = vpack.c.bf16 %v648_v46, %v647_v45 }
 0x140   : > { %v657_v29 = vpack.c.bf16 %v646_v27, %v645_v26 }
 0x141   : > { %1190 = vmatprep.mubr.bf16.mxu0 %v653_v28  ;;  %v627_v53 = vld [vmem:[#allocation2 + $0x30] sm:$0xff] }
 0x142   : > { %1198 = vmatprep.mubr.bf16.mxu1 %v657_v29  ;;  %v625_v39 = vld [vmem:[#allocation2 + $0x20] sm:$0xff]  ;;  %v635_v57 = vld [vmem:[#allocation2 + $0x70] sm:$0xff]  ;;  %1191 = vmatmul.mubr.bf16.vlgmr.msra.gmra.mrb[0].mxu0 %v654_v51  ;;  %v643_v59 = vmax.f32 %v627_v53, 0.0 }
 0x143   : > { %v633_v41 = vld [vmem:[#allocation2 + $0x60] sm:$0xff]  ;;  %v641_v47 = vmax.f32 %v625_v39, 0.0  ;;  %v628_v56 = vld [vmem:[#allocation2 + $0x38] sm:$0xff]  ;;  %1199 = vmatmul.mubr.bf16.vlgmr.msra.gmra.mrb[0].mxu1 %v658_v52  ;;  %v651_v61 = vmax.f32 %v635_v57, 0.0 }
 0x144   : > { %v626_v40 = vld [vmem:[#allocation2 + $0x28] sm:$0xff]  ;;  %v649_v49 = vmax.f32 %v633_v41, 0.0  ;;  %v636_v58 = vld [vmem:[#allocation2 + $0x78] sm:$0xff]  ;;  %v644_v60 = vmax.f32 %v628_v56, 0.0 }
 0x145   : > { %v634_v42 = vld [vmem:[#allocation2 + $0x68] sm:$0xff]  ;;  %v642_v48 = vmax.f32 %v626_v40, 0.0  ;;  %v652_v62 = vmax.f32 %v636_v58, 0.0 }
 0x146   : > { %v650_v50 = vmax.f32 %v634_v42, 0.0  ;;  %v656_v63 = vpack.c.bf16 %v644_v60, %v643_v59 }
 0x147   : > { %v655_v54 = vpack.c.bf16 %v642_v48, %v641_v47  ;;  %v660_v0 = vpack.c.bf16 %v652_v62, %v651_v61 }
 0x148   : > { %v659_v55 = vpack.c.bf16 %v650_v50, %v649_v49 }
 0x149   : > { %1194 = vmatprep.mubr.bf16.mxu0 %v655_v54 }
 0x14a   : > { %1202 = vmatprep.mubr.bf16.mxu1 %v659_v55  ;;  %1195 = vmatmul.mubr.bf16.gmra.mrb[4].mxu0 %v656_v63 }
 0x14b   : > { %1203 = vmatmul.mubr.bf16.gmra.mrb[4].mxu1 %v660_v0 }
 0x215   : > { %v1192_v1 = vpop.f32.mrb[0].mxu0 }
 0x216   : > { %v1200_v3 = vpop.f32.mrb[0].mxu1  ;;  %v766_v4 = vpop.f32.mrb[1].mxu0  ;;  %v775_v8 = vadd.f32 %v1192_v1, %v1019_v2 }
 0x217   : > { %v798_v5 = vpop.f32.mrb[1].mxu1  ;;  %v1193_v6 = vpop.f32.mrb[2].mxu0  ;;  %v807_v9 = vadd.f32 %v1200_v3, %v1019_v2  ;;  %v767_v14 = vadd.f32 %v1019_v2, %v766_v4 }
 0x218   : > { %v1201_v7 = vpop.f32.mrb[2].mxu1  ;;  %v778_v10 = vadd.f32 %v1193_v6, %v1019_v2  ;;  %v769_v12 = vpop.f32.mrb[3].mxu0  ;;  %v799_v15 = vadd.f32 %v1019_v2, %v798_v5 }
 0x219   : > { %v810_v11 = vadd.f32 %v1201_v7, %v1019_v2  ;;  %v801_v13 = vpop.f32.mrb[3].mxu1  ;;  %v770_v16 = vadd.f32 %v1019_v2, %v769_v12 }
 0x21a   : > { %v802_v17 = vadd.f32 %v1019_v2, %v801_v13  ;;  %v1071_v18 = vpack.c.bf16 %v778_v10, %v775_v8 }
 0x21b   : > { %v1091_v19 = vpack.c.bf16 %v810_v11, %v807_v9  ;;  %v1066_v20 = vpack.c.bf16 %v770_v16, %v767_v14 }
 0x21c   : > { %v1086_v21 = vpack.c.bf16 %v802_v17, %v799_v15  ;;  %1103 = vst [vmem:[%s1486_s27 + $0x8] sm:$0xff] %v1071_v18  }
 0x21d   : > { %1107 = vst [vmem:[%s1486_s27 + $0x28] sm:$0xff] %v1091_v19   ;;  %1067 = vst [vmem:[%s1486_s27] sm:$0xff] %v1066_v20   ;;  %v1196_v22 = vpop.f32.mrb[4].mxu0 }
 0x21e   : > { %1106 = vst [vmem:[%s1486_s27 + $0x20] sm:$0xff] %v1086_v21   ;;  %v1204_v23 = vpop.f32.mrb[4].mxu1  ;;  %v782_v24 = vpop.f32.mrb[5].mxu0  ;;  %v791_v28 = vadd.f32 %v1196_v22, %v1019_v2 }
 0x21f   : > { %v814_v25 = vpop.f32.mrb[5].mxu1  ;;  %v1197_v26 = vpop.f32.mrb[6].mxu0  ;;  %v823_v29 = vadd.f32 %v1204_v23, %v1019_v2  ;;  %v783_v34 = vadd.f32 %v1019_v2, %v782_v24 }
 0x220   : > { %v1205_v27 = vpop.f32.mrb[6].mxu1  ;;  %v794_v30 = vadd.f32 %v1197_v26, %v1019_v2  ;;  %v785_v32 = vpop.f32.mrb[7].mxu0  ;;  %v815_v35 = vadd.f32 %v1019_v2, %v814_v25 }
 0x221   : > { %v826_v31 = vadd.f32 %v1205_v27, %v1019_v2  ;;  %v817_v33 = vpop.f32.mrb[7].mxu1  ;;  %v786_v36 = vadd.f32 %v1019_v2, %v785_v32 }
 0x222   : > { %v818_v37 = vadd.f32 %v1019_v2, %v817_v33  ;;  %v1081_v38 = vpack.c.bf16 %v794_v30, %v791_v28 }
 0x223   : > { %v1101_v39 = vpack.c.bf16 %v826_v31, %v823_v29  ;;  %v1076_v40 = vpack.c.bf16 %v786_v36, %v783_v34 }
 0x224   : > { %v1096_v41 = vpack.c.bf16 %v818_v37, %v815_v35  ;;  %1105 = vst [vmem:[%s1486_s27 + $0x18] sm:$0xff] %v1081_v38  }
 0x225   : > { %1109 = vst [vmem:[%s1486_s27 + $0x38] sm:$0xff] %v1101_v39   ;;  %1104 = vst [vmem:[%s1486_s27 + $0x10] sm:$0xff] %v1076_v40  }
 0x226   : > { %1108 = vst [vmem:[%s1486_s27 + $0x30] sm:$0xff] %v1096_v41  }
 0x227 PF: > { %s14_s21 = sadd.s32 1, %s1373_s21   ;;  %s1575_s15 = smov %s1353_s16 }
 0x228   : > { %p11_p13 = scmp.ge.s32.totalorder %s14_s21, 6   ;;  %s1576_s16 = smov %s1452_s28 }
 0x229   : > { %s1577_s17 = smov %s1365_s19  ;;  %s1578_s18 = smov %s1369_s20 }
 0x22a   : > { %s1579_s19 = smov %s1582_s22  ;;  %s1580_s20 = smov %s1586_s23 }
 0x22b   :  { %13 = sbr.rel (!%p11_p13) target bundleno = 4 (0x4), region = 121 }

</bundles_post_ra>
